<compile_context>
chip_gen: v7x
topology: tpu7x:2x2x1
jax: 0.10.0
libtpu: 0.0.40
codegen_flags: <defaults>
</compile_context>

<pallas_src>
import jax
import jax.numpy as jnp
from jax import lax
from jax.experimental import pallas as pl
from jax.experimental.pallas import tpu as pltpu

EPS = 1e-5


def _make_kernel(C, H, W, compute_dtype):
    HW = H * W
    inv_hw = 1.0 / float(HW)

    def _shift(x, d):
        """y[:, p] = x[:, (p + d) mod HW] for static d (concat of two slices)."""
        d = d % HW
        if d == 0:
            return x
        return jnp.concatenate([x[:, d:], x[:, :d]], axis=1)

    def _conv3x3(x, w_ref, masks):
        """Reflection-padded 3x3 conv as 9 accumulated (C,C)x(C,HW) matmuls."""
        is_j0, is_jW, is_i0, is_iH = masks
        s_m1 = _shift(x, -1)          # x[:, p-1]
        s_p1 = _shift(x, +1)          # x[:, p+1]
        # column-reflected shifts: xc[dj][c, i, j] = x[c, i, reflect(j + dj)]
        xc = {
            -1: jnp.where(is_j0, s_p1, s_m1),
             0: x,
            +1: jnp.where(is_jW, s_m1, s_p1),
        }
        acc = jnp.zeros((C, HW), jnp.float32)
        for kj in range(3):
            dj = kj - 1
            base = xc[dj]
            r_mW = _shift(base, -W)   # base[:, p-W]  (row above)
            r_pW = _shift(base, +W)   # base[:, p+W]  (row below)
            # row-reflected shifts of the column-corrected tensor
            rows = {
                -1: jnp.where(is_i0, r_pW, r_mW),
                 0: base,
                +1: jnp.where(is_iH, r_mW, r_pW),
            }
            for ki in range(3):
                di = ki - 1
                t = ki * 3 + kj       # matches host-side (3,3)->9 flattening
                acc = acc + jnp.dot(
                    w_ref[t].astype(compute_dtype),
                    rows[di].astype(compute_dtype),
                    preferred_element_type=jnp.float32,
                )
        return acc

    def _instance_norm(y, g_ref, be_ref):
        # Single-pass stats: var = E[y^2] - mean^2 (biased, PyTorch default).
        s = jnp.sum(y, axis=1, keepdims=True)
        sq = jnp.sum(y * y, axis=1, keepdims=True)
        mean = s * inv_hw
        var = sq * inv_hw - mean * mean
        scale = g_ref[...] * lax.rsqrt(var + EPS)      # (C, 1)
        shift = be_ref[...] - mean * scale             # (C, 1)
        return y * scale + shift

    def kernel(x_ref, w1_ref, g1_ref, be1_ref, w2_ref, g2_ref, be2_ref, o_ref):
        x = x_ref[0].astype(jnp.float32)               # (C, HW), lane-dense

        # Boundary masks in flat (1, HW) form (reused by both convs).
        col = lax.broadcasted_iota(jnp.int32, (1, H, W), 2).reshape(1, HW)
        p = lax.broadcasted_iota(jnp.int32, (1, HW), 1)
        masks = (col == 0, col == W - 1, p < W, p >= (H - 1) * W)

        # branch 1: conv -> instance norm -> relu     (conv bias cancelled by IN)
        y = _conv3x3(x, w1_ref, masks)
        y = jnp.maximum(_instance_norm(y, g1_ref, be1_ref), 0.0)

        # branch 2: conv -> instance norm
        z = _conv3x3(y, w2_ref, masks)
        z = _instance_norm(z, g2_ref, be2_ref)

        # residual add
        o_ref[0] = (x + z).astype(o_ref.dtype)

    return kernel


def _weights_to_taps(w):
    """OIHW (C, C, 3, 3) -> (9, C_out, C_in), lane-dense, tap t = ki*3 + kj."""
    C = w.shape[0]
    return jnp.transpose(w, (2, 3, 0, 1)).reshape(9, C, C)


def residual_block(x, params, *, compute_dtype=jnp.float32):
    """x: (B, C, H, W) float32.  params: dict of conv / instance-norm params."""
    B, C, H, W = x.shape
    HW = H * W
    kernel = _make_kernel(C, H, W, compute_dtype)

    x_flat = x.reshape(B, C, HW)                      # lane-dense activations
    w1 = _weights_to_taps(params["w1"])
    w2 = _weights_to_taps(params["w2"])
    # Conv biases b1/b2 are intentionally not passed (cancelled by InstanceNorm).
    g1 = params["g1"].reshape(C, 1)
    be1 = params["be1"].reshape(C, 1)
    g2 = params["g2"].reshape(C, 1)
    be2 = params["be2"].reshape(C, 1)

    full3 = lambda b: (0, 0, 0)
    full2 = lambda b: (0, 0)

    flops = 4 * 9 * B * C * C * HW                    # two 3x3 convs, 2 flops/MAC
    bytes_accessed = (2 * B * C * HW + 2 * 9 * C * C + 4 * C) * 4

    out_flat = pl.pallas_call(
        kernel,
        out_shape=jax.ShapeDtypeStruct((B, C, HW), jnp.float32),
        grid_spec=pltpu.PrefetchScalarGridSpec(
            num_scalar_prefetch=0,
            grid=(B,),
            in_specs=[
                pl.BlockSpec((1, C, HW), lambda b: (b, 0, 0)),   # x, one sample per step
                pl.BlockSpec((9, C, C), full3),                  # w1 taps
                pl.BlockSpec((C, 1), full2),                     # gamma1
                pl.BlockSpec((C, 1), full2),                     # beta1
                pl.BlockSpec((9, C, C), full3),                  # w2 taps
                pl.BlockSpec((C, 1), full2),                     # gamma2
                pl.BlockSpec((C, 1), full2),                     # beta2
            ],
            out_specs=pl.BlockSpec((1, C, HW), lambda b: (b, 0, 0)),
        ),
        compiler_params=pltpu.CompilerParams(
            dimension_semantics=("parallel",),
            vmem_limit_bytes=64 * 1024 * 1024,
        ),
        cost_estimate=pl.CostEstimate(
            flops=flops,
            transcendentals=2 * B * C,
            bytes_accessed=bytes_accessed,
        ),
    )(x_flat, w1, g1, be1, w2, g2, be2)

    return out_flat.reshape(B, C, H, W)


def residual_block_ref(x, params):
    """Pure-JAX reference mirroring the PyTorch forward (biases included)."""
    def conv(x, w, b):
        xp = jnp.pad(x, ((0, 0), (0, 0), (1, 1), (1, 1)), mode="reflect")
        y = lax.conv_general_dilated(
            xp, w, window_strides=(1, 1), padding="VALID",
            dimension_numbers=("NCHW", "OIHW", "NCHW"))
        return y + b[None, :, None, None]

    def inorm(y, g, be):
        m = jnp.mean(y, axis=(2, 3), keepdims=True)
        v = jnp.mean((y - m) ** 2, axis=(2, 3), keepdims=True)
        return g[None, :, None, None] * (y - m) * lax.rsqrt(v + EPS) + be[None, :, None, None]

    out = jnp.maximum(inorm(conv(x, params["w1"], params["b1"]), params["g1"], params["be1"]), 0.0)
    out = inorm(conv(out, params["w2"], params["b2"]), params["g2"], params["be2"])
    return x + out


def init_params(key, C):
    """Deterministic init (conv: uniform a la PyTorch; IN: gamma=1, beta=0)."""
    k1, k2, k3, k4 = jax.random.split(key, 4)
    fan_in = C * 3 * 3
    bound = 1.0 / jnp.sqrt(fan_in)
    return {
        "w1": jax.random.uniform(k1, (C, C, 3, 3), jnp.float32, -bound, bound),
        "b1": jax.random.uniform(k2, (C,), jnp.float32, -bound, bound),
        "g1": jnp.ones((C,), jnp.float32),
        "be1": jnp.zeros((C,), jnp.float32),
        "w2": jax.random.uniform(k3, (C, C, 3, 3), jnp.float32, -bound, bound),
        "b2": jax.random.uniform(k4, (C,), jnp.float32, -bound, bound),
        "g2": jnp.ones((C,), jnp.float32),
        "be2": jnp.zeros((C,), jnp.float32),
    }


if __name__ == "__main__":
    B, C, H, W = 2, 4, 16, 16
    key = jax.random.PRNGKey(0)
    kx, kp = jax.random.split(key)
    x = jax.random.normal(kx, (B, C, H, W), jnp.float32)
    params = init_params(kp, C)

    out = residual_block(x, params)
    out = jax.block_until_ready(out)

    ref = jax.block_until_ready(residual_block_ref(x, params))
    assert out.shape == (B, C, H, W)
    assert jnp.allclose(out, ref, atol=1e-4, rtol=1e-4), float(jnp.max(jnp.abs(out - ref)))

    print("KERNEL_OK")
</pallas_src>

<mosaic_0001>
module attributes {stable_mosaic.version = 11 : i64} {
  func.func @kernel(%arg0: i32, %arg1: memref<1x4x256xf32, #tpu.memory_space<vmem>>, %arg2: memref<9x4x4xf32, #tpu.memory_space<vmem>>, %arg3: memref<4x1xf32, #tpu.memory_space<vmem>>, %arg4: memref<4x1xf32, #tpu.memory_space<vmem>>, %arg5: memref<9x4x4xf32, #tpu.memory_space<vmem>>, %arg6: memref<4x1xf32, #tpu.memory_space<vmem>>, %arg7: memref<4x1xf32, #tpu.memory_space<vmem>>, %arg8: memref<1x4x256xf32, #tpu.memory_space<vmem>>) attributes {dimension_semantics = [#tpu.dimension_semantics<parallel>], iteration_bounds = array<i64: 2>, scalar_prefetch = 0 : i64, scratch_operands = 0 : i64, tpu.core_type = #tpu.core_type<tc>, window_params = [{transform_indices = @transform_0, window_bounds = array<i64: 1, 4, 256>}, {pipeline_mode = #tpu.pipeline_mode<synchronous>, transform_indices = @transform_1, window_bounds = array<i64: 9, 4, 4>}, {pipeline_mode = #tpu.pipeline_mode<synchronous>, transform_indices = @transform_2, window_bounds = array<i64: 4, 1>}, {pipeline_mode = #tpu.pipeline_mode<synchronous>, transform_indices = @transform_3, window_bounds = array<i64: 4, 1>}, {pipeline_mode = #tpu.pipeline_mode<synchronous>, transform_indices = @transform_4, window_bounds = array<i64: 9, 4, 4>}, {pipeline_mode = #tpu.pipeline_mode<synchronous>, transform_indices = @transform_5, window_bounds = array<i64: 4, 1>}, {pipeline_mode = #tpu.pipeline_mode<synchronous>, transform_indices = @transform_6, window_bounds = array<i64: 4, 1>}, {transform_indices = @transform_7, window_bounds = array<i64: 1, 4, 256>}]} {
    %c0 = arith.constant 0 : index
    %c0_0 = arith.constant 0 : index
    %c0_1 = arith.constant 0 : index
    %0 = vector.load %arg1[%c0, %c0_0, %c0_1] : memref<1x4x256xf32, #tpu.memory_space<vmem>>, vector<1x4x256xf32>
    %1 = vector.shape_cast %0 : vector<1x4x256xf32> to vector<4x256xf32>
    %2 = tpu.iota {dimensions = array<i32: 2>} : vector<1x16x16xi32>
    %3 = vector.shape_cast %2 : vector<1x16x16xi32> to vector<1x256xi32>
    %4 = tpu.iota {dimensions = array<i32: 1>} : vector<1x256xi32>
    %c0_i32 = arith.constant 0 : i32
    %5 = vector.broadcast %c0_i32 : i32 to vector<1x256xi32>
    %6 = arith.cmpi eq, %3, %5 : vector<1x256xi32>
    %c15_i32 = arith.constant 15 : i32
    %7 = vector.broadcast %c15_i32 : i32 to vector<1x256xi32>
    %8 = arith.cmpi eq, %3, %7 : vector<1x256xi32>
    %c16_i32 = arith.constant 16 : i32
    %9 = vector.broadcast %c16_i32 : i32 to vector<1x256xi32>
    %10 = arith.cmpi slt, %4, %9 : vector<1x256xi32>
    %c240_i32 = arith.constant 240 : i32
    %11 = vector.broadcast %c240_i32 : i32 to vector<1x256xi32>
    %12 = arith.cmpi sge, %4, %11 : vector<1x256xi32>
    %13 = vector.extract_strided_slice %1 {offsets = [0, 255], sizes = [4, 1], strides = [1, 1]} : vector<4x256xf32> to vector<4x1xf32>
    %14 = vector.extract_strided_slice %1 {offsets = [0, 0], sizes = [4, 255], strides = [1, 1]} : vector<4x256xf32> to vector<4x255xf32>
    %15 = tpu.concatenate %13, %14 in 1 : vector<4x1xf32>, vector<4x255xf32> -> vector<4x256xf32>
    %16 = vector.extract_strided_slice %1 {offsets = [0, 1], sizes = [4, 255], strides = [1, 1]} : vector<4x256xf32> to vector<4x255xf32>
    %17 = vector.extract_strided_slice %1 {offsets = [0, 0], sizes = [4, 1], strides = [1, 1]} : vector<4x256xf32> to vector<4x1xf32>
    %18 = tpu.concatenate %16, %17 in 1 : vector<4x255xf32>, vector<4x1xf32> -> vector<4x256xf32>
    %19 = vector.shape_cast %6 : vector<1x256xi1> to vector<1x256xi1>
    %20 = vector.broadcast %19 : vector<1x256xi1> to vector<4x256xi1>
    %21 = arith.select %20, %18, %15 : vector<4x256xi1>, vector<4x256xf32>
    %22 = vector.shape_cast %8 : vector<1x256xi1> to vector<1x256xi1>
    %23 = vector.broadcast %22 : vector<1x256xi1> to vector<4x256xi1>
    %24 = arith.select %23, %15, %18 : vector<4x256xi1>, vector<4x256xf32>
    %cst = arith.constant 0.000000e+00 : f32
    %25 = vector.broadcast %cst : f32 to vector<4x256xf32>
    %26 = vector.extract_strided_slice %21 {offsets = [0, 240], sizes = [4, 16], strides = [1, 1]} : vector<4x256xf32> to vector<4x16xf32>
    %27 = vector.extract_strided_slice %21 {offsets = [0, 0], sizes = [4, 240], strides = [1, 1]} : vector<4x256xf32> to vector<4x240xf32>
    %28 = tpu.concatenate %26, %27 in 1 : vector<4x16xf32>, vector<4x240xf32> -> vector<4x256xf32>
    %29 = vector.extract_strided_slice %21 {offsets = [0, 16], sizes = [4, 240], strides = [1, 1]} : vector<4x256xf32> to vector<4x240xf32>
    %30 = vector.extract_strided_slice %21 {offsets = [0, 0], sizes = [4, 16], strides = [1, 1]} : vector<4x256xf32> to vector<4x16xf32>
    %31 = tpu.concatenate %29, %30 in 1 : vector<4x240xf32>, vector<4x16xf32> -> vector<4x256xf32>
    %32 = vector.shape_cast %10 : vector<1x256xi1> to vector<1x256xi1>
    %33 = vector.broadcast %32 : vector<1x256xi1> to vector<4x256xi1>
    %34 = arith.select %33, %31, %28 : vector<4x256xi1>, vector<4x256xf32>
    %35 = vector.shape_cast %12 : vector<1x256xi1> to vector<1x256xi1>
    %36 = vector.broadcast %35 : vector<1x256xi1> to vector<4x256xi1>
    %37 = arith.select %36, %28, %31 : vector<4x256xi1>, vector<4x256xf32>
    %c0_2 = arith.constant 0 : index
    %c0_3 = arith.constant 0 : index
    %c0_4 = arith.constant 0 : index
    %38 = vector.load %arg2[%c0_2, %c0_3, %c0_4] : memref<9x4x4xf32, #tpu.memory_space<vmem>>, vector<1x4x4xf32>
    %39 = vector.shape_cast %38 : vector<1x4x4xf32> to vector<4x4xf32>
    %cst_5 = arith.constant dense<0.000000e+00> : vector<4x256xf32>
    %40 = tpu.matmul %39, %34, %cst_5 {dimension_numbers = #tpu.dot_dimension_numbers<[1], [0], [0], [1], [0, 0, 1, 1], [], []>} : vector<4x4xf32>, vector<4x256xf32>, vector<4x256xf32> -> vector<4x256xf32>
    %41 = arith.addf %25, %40 : vector<4x256xf32>
    %c3 = arith.constant 3 : index
    %c0_6 = arith.constant 0 : index
    %c0_7 = arith.constant 0 : index
    %42 = vector.load %arg2[%c3, %c0_6, %c0_7] : memref<9x4x4xf32, #tpu.memory_space<vmem>>, vector<1x4x4xf32>
    %43 = vector.shape_cast %42 : vector<1x4x4xf32> to vector<4x4xf32>
    %cst_8 = arith.constant dense<0.000000e+00> : vector<4x256xf32>
    %44 = tpu.matmul %43, %21, %cst_8 {dimension_numbers = #tpu.dot_dimension_numbers<[1], [0], [0], [1], [0, 0, 1, 1], [], []>} : vector<4x4xf32>, vector<4x256xf32>, vector<4x256xf32> -> vector<4x256xf32>
    %45 = arith.addf %41, %44 : vector<4x256xf32>
    %c6 = arith.constant 6 : index
    %c0_9 = arith.constant 0 : index
    %c0_10 = arith.constant 0 : index
    %46 = vector.load %arg2[%c6, %c0_9, %c0_10] : memref<9x4x4xf32, #tpu.memory_space<vmem>>, vector<1x4x4xf32>
    %47 = vector.shape_cast %46 : vector<1x4x4xf32> to vector<4x4xf32>
    %cst_11 = arith.constant dense<0.000000e+00> : vector<4x256xf32>
    %48 = tpu.matmul %47, %37, %cst_11 {dimension_numbers = #tpu.dot_dimension_numbers<[1], [0], [0], [1], [0, 0, 1, 1], [], []>} : vector<4x4xf32>, vector<4x256xf32>, vector<4x256xf32> -> vector<4x256xf32>
    %49 = arith.addf %45, %48 : vector<4x256xf32>
    %50 = vector.extract_strided_slice %1 {offsets = [0, 240], sizes = [4, 16], strides = [1, 1]} : vector<4x256xf32> to vector<4x16xf32>
    %51 = vector.extract_strided_slice %1 {offsets = [0, 0], sizes = [4, 240], strides = [1, 1]} : vector<4x256xf32> to vector<4x240xf32>
    %52 = tpu.concatenate %50, %51 in 1 : vector<4x16xf32>, vector<4x240xf32> -> vector<4x256xf32>
    %53 = vector.extract_strided_slice %1 {offsets = [0, 16], sizes = [4, 240], strides = [1, 1]} : vector<4x256xf32> to vector<4x240xf32>
    %54 = vector.extract_strided_slice %1 {offsets = [0, 0], sizes = [4, 16], strides = [1, 1]} : vector<4x256xf32> to vector<4x16xf32>
    %55 = tpu.concatenate %53, %54 in 1 : vector<4x240xf32>, vector<4x16xf32> -> vector<4x256xf32>
    %56 = vector.shape_cast %10 : vector<1x256xi1> to vector<1x256xi1>
    %57 = vector.broadcast %56 : vector<1x256xi1> to vector<4x256xi1>
    %58 = arith.select %57, %55, %52 : vector<4x256xi1>, vector<4x256xf32>
    %59 = vector.shape_cast %12 : vector<1x256xi1> to vector<1x256xi1>
    %60 = vector.broadcast %59 : vector<1x256xi1> to vector<4x256xi1>
    %61 = arith.select %60, %52, %55 : vector<4x256xi1>, vector<4x256xf32>
    %c1 = arith.constant 1 : index
    %c0_12 = arith.constant 0 : index
    %c0_13 = arith.constant 0 : index
    %62 = vector.load %arg2[%c1, %c0_12, %c0_13] : memref<9x4x4xf32, #tpu.memory_space<vmem>>, vector<1x4x4xf32>
    %63 = vector.shape_cast %62 : vector<1x4x4xf32> to vector<4x4xf32>
    %cst_14 = arith.constant dense<0.000000e+00> : vector<4x256xf32>
    %64 = tpu.matmul %63, %58, %cst_14 {dimension_numbers = #tpu.dot_dimension_numbers<[1], [0], [0], [1], [0, 0, 1, 1], [], []>} : vector<4x4xf32>, vector<4x256xf32>, vector<4x256xf32> -> vector<4x256xf32>
    %65 = arith.addf %49, %64 : vector<4x256xf32>
    %c4 = arith.constant 4 : index
    %c0_15 = arith.constant 0 : index
    %c0_16 = arith.constant 0 : index
    %66 = vector.load %arg2[%c4, %c0_15, %c0_16] : memref<9x4x4xf32, #tpu.memory_space<vmem>>, vector<1x4x4xf32>
    %67 = vector.shape_cast %66 : vector<1x4x4xf32> to vector<4x4xf32>
    %cst_17 = arith.constant dense<0.000000e+00> : vector<4x256xf32>
    %68 = tpu.matmul %67, %1, %cst_17 {dimension_numbers = #tpu.dot_dimension_numbers<[1], [0], [0], [1], [0, 0, 1, 1], [], []>} : vector<4x4xf32>, vector<4x256xf32>, vector<4x256xf32> -> vector<4x256xf32>
    %69 = arith.addf %65, %68 : vector<4x256xf32>
    %c7 = arith.constant 7 : index
    %c0_18 = arith.constant 0 : index
    %c0_19 = arith.constant 0 : index
    %70 = vector.load %arg2[%c7, %c0_18, %c0_19] : memref<9x4x4xf32, #tpu.memory_space<vmem>>, vector<1x4x4xf32>
    %71 = vector.shape_cast %70 : vector<1x4x4xf32> to vector<4x4xf32>
    %cst_20 = arith.constant dense<0.000000e+00> : vector<4x256xf32>
    %72 = tpu.matmul %71, %61, %cst_20 {dimension_numbers = #tpu.dot_dimension_numbers<[1], [0], [0], [1], [0, 0, 1, 1], [], []>} : vector<4x4xf32>, vector<4x256xf32>, vector<4x256xf32> -> vector<4x256xf32>
    %73 = arith.addf %69, %72 : vector<4x256xf32>
    %74 = vector.extract_strided_slice %24 {offsets = [0, 240], sizes = [4, 16], strides = [1, 1]} : vector<4x256xf32> to vector<4x16xf32>
    %75 = vector.extract_strided_slice %24 {offsets = [0, 0], sizes = [4, 240], strides = [1, 1]} : vector<4x256xf32> to vector<4x240xf32>
    %76 = tpu.concatenate %74, %75 in 1 : vector<4x16xf32>, vector<4x240xf32> -> vector<4x256xf32>
    %77 = vector.extract_strided_slice %24 {offsets = [0, 16], sizes = [4, 240], strides = [1, 1]} : vector<4x256xf32> to vector<4x240xf32>
    %78 = vector.extract_strided_slice %24 {offsets = [0, 0], sizes = [4, 16], strides = [1, 1]} : vector<4x256xf32> to vector<4x16xf32>
    %79 = tpu.concatenate %77, %78 in 1 : vector<4x240xf32>, vector<4x16xf32> -> vector<4x256xf32>
    %80 = vector.shape_cast %10 : vector<1x256xi1> to vector<1x256xi1>
    %81 = vector.broadcast %80 : vector<1x256xi1> to vector<4x256xi1>
    %82 = arith.select %81, %79, %76 : vector<4x256xi1>, vector<4x256xf32>
    %83 = vector.shape_cast %12 : vector<1x256xi1> to vector<1x256xi1>
    %84 = vector.broadcast %83 : vector<1x256xi1> to vector<4x256xi1>
    %85 = arith.select %84, %76, %79 : vector<4x256xi1>, vector<4x256xf32>
    %c2 = arith.constant 2 : index
    %c0_21 = arith.constant 0 : index
    %c0_22 = arith.constant 0 : index
    %86 = vector.load %arg2[%c2, %c0_21, %c0_22] : memref<9x4x4xf32, #tpu.memory_space<vmem>>, vector<1x4x4xf32>
    %87 = vector.shape_cast %86 : vector<1x4x4xf32> to vector<4x4xf32>
    %cst_23 = arith.constant dense<0.000000e+00> : vector<4x256xf32>
    %88 = tpu.matmul %87, %82, %cst_23 {dimension_numbers = #tpu.dot_dimension_numbers<[1], [0], [0], [1], [0, 0, 1, 1], [], []>} : vector<4x4xf32>, vector<4x256xf32>, vector<4x256xf32> -> vector<4x256xf32>
    %89 = arith.addf %73, %88 : vector<4x256xf32>
    %c5 = arith.constant 5 : index
    %c0_24 = arith.constant 0 : index
    %c0_25 = arith.constant 0 : index
    %90 = vector.load %arg2[%c5, %c0_24, %c0_25] : memref<9x4x4xf32, #tpu.memory_space<vmem>>, vector<1x4x4xf32>
    %91 = vector.shape_cast %90 : vector<1x4x4xf32> to vector<4x4xf32>
    %cst_26 = arith.constant dense<0.000000e+00> : vector<4x256xf32>
    %92 = tpu.matmul %91, %24, %cst_26 {dimension_numbers = #tpu.dot_dimension_numbers<[1], [0], [0], [1], [0, 0, 1, 1], [], []>} : vector<4x4xf32>, vector<4x256xf32>, vector<4x256xf32> -> vector<4x256xf32>
    %93 = arith.addf %89, %92 : vector<4x256xf32>
    %c8 = arith.constant 8 : index
    %c0_27 = arith.constant 0 : index
    %c0_28 = arith.constant 0 : index
    %94 = vector.load %arg2[%c8, %c0_27, %c0_28] : memref<9x4x4xf32, #tpu.memory_space<vmem>>, vector<1x4x4xf32>
    %95 = vector.shape_cast %94 : vector<1x4x4xf32> to vector<4x4xf32>
    %cst_29 = arith.constant dense<0.000000e+00> : vector<4x256xf32>
    %96 = tpu.matmul %95, %85, %cst_29 {dimension_numbers = #tpu.dot_dimension_numbers<[1], [0], [0], [1], [0, 0, 1, 1], [], []>} : vector<4x4xf32>, vector<4x256xf32>, vector<4x256xf32> -> vector<4x256xf32>
    %97 = arith.addf %93, %96 : vector<4x256xf32>
    %cst_30 = arith.constant dense<0.000000e+00> : vector<4xf32>
    %98 = vector.multi_reduction <add>, %97, %cst_30 [1] : vector<4x256xf32> to vector<4xf32>
    %99 = vector.shape_cast %98 : vector<4xf32> to vector<4x1xf32>
    %100 = arith.mulf %97, %97 : vector<4x256xf32>
    %cst_31 = arith.constant dense<0.000000e+00> : vector<4xf32>
    %101 = vector.multi_reduction <add>, %100, %cst_31 [1] : vector<4x256xf32> to vector<4xf32>
    %102 = vector.shape_cast %101 : vector<4xf32> to vector<4x1xf32>
    %cst_32 = arith.constant 3.906250e-03 : f32
    %103 = vector.broadcast %cst_32 : f32 to vector<4x1xf32>
    %104 = arith.mulf %99, %103 : vector<4x1xf32>
    %cst_33 = arith.constant 3.906250e-03 : f32
    %105 = vector.broadcast %cst_33 : f32 to vector<4x1xf32>
    %106 = arith.mulf %102, %105 : vector<4x1xf32>
    %107 = arith.mulf %104, %104 : vector<4x1xf32>
    %108 = arith.subf %106, %107 : vector<4x1xf32>
    %c0_34 = arith.constant 0 : index
    %c0_35 = arith.constant 0 : index
    %109 = vector.load %arg3[%c0_34, %c0_35] : memref<4x1xf32, #tpu.memory_space<vmem>>, vector<4x1xf32>
    %cst_36 = arith.constant 9.99999974E-6 : f32
    %110 = vector.broadcast %cst_36 : f32 to vector<4x1xf32>
    %111 = arith.addf %108, %110 : vector<4x1xf32>
    %112 = math.rsqrt %111 : vector<4x1xf32>
    %113 = arith.mulf %109, %112 : vector<4x1xf32>
    %c0_37 = arith.constant 0 : index
    %c0_38 = arith.constant 0 : index
    %114 = vector.load %arg4[%c0_37, %c0_38] : memref<4x1xf32, #tpu.memory_space<vmem>>, vector<4x1xf32>
    %115 = arith.mulf %104, %113 : vector<4x1xf32>
    %116 = arith.subf %114, %115 : vector<4x1xf32>
    %117 = vector.broadcast %113 : vector<4x1xf32> to vector<4x256xf32>
    %118 = arith.mulf %97, %117 : vector<4x256xf32>
    %119 = vector.broadcast %116 : vector<4x1xf32> to vector<4x256xf32>
    %120 = arith.addf %118, %119 : vector<4x256xf32>
    %cst_39 = arith.constant 0.000000e+00 : f32
    %121 = vector.broadcast %cst_39 : f32 to vector<4x256xf32>
    %122 = arith.maximumf %120, %121 : vector<4x256xf32>
    %123 = vector.extract_strided_slice %122 {offsets = [0, 255], sizes = [4, 1], strides = [1, 1]} : vector<4x256xf32> to vector<4x1xf32>
    %124 = vector.extract_strided_slice %122 {offsets = [0, 0], sizes = [4, 255], strides = [1, 1]} : vector<4x256xf32> to vector<4x255xf32>
    %125 = tpu.concatenate %123, %124 in 1 : vector<4x1xf32>, vector<4x255xf32> -> vector<4x256xf32>
    %126 = vector.extract_strided_slice %122 {offsets = [0, 1], sizes = [4, 255], strides = [1, 1]} : vector<4x256xf32> to vector<4x255xf32>
    %127 = vector.extract_strided_slice %122 {offsets = [0, 0], sizes = [4, 1], strides = [1, 1]} : vector<4x256xf32> to vector<4x1xf32>
    %128 = tpu.concatenate %126, %127 in 1 : vector<4x255xf32>, vector<4x1xf32> -> vector<4x256xf32>
    %129 = vector.shape_cast %6 : vector<1x256xi1> to vector<1x256xi1>
    %130 = vector.broadcast %129 : vector<1x256xi1> to vector<4x256xi1>
    %131 = arith.select %130, %128, %125 : vector<4x256xi1>, vector<4x256xf32>
    %132 = vector.shape_cast %8 : vector<1x256xi1> to vector<1x256xi1>
    %133 = vector.broadcast %132 : vector<1x256xi1> to vector<4x256xi1>
    %134 = arith.select %133, %125, %128 : vector<4x256xi1>, vector<4x256xf32>
    %cst_40 = arith.constant 0.000000e+00 : f32
    %135 = vector.broadcast %cst_40 : f32 to vector<4x256xf32>
    %136 = vector.extract_strided_slice %131 {offsets = [0, 240], sizes = [4, 16], strides = [1, 1]} : vector<4x256xf32> to vector<4x16xf32>
    %137 = vector.extract_strided_slice %131 {offsets = [0, 0], sizes = [4, 240], strides = [1, 1]} : vector<4x256xf32> to vector<4x240xf32>
    %138 = tpu.concatenate %136, %137 in 1 : vector<4x16xf32>, vector<4x240xf32> -> vector<4x256xf32>
    %139 = vector.extract_strided_slice %131 {offsets = [0, 16], sizes = [4, 240], strides = [1, 1]} : vector<4x256xf32> to vector<4x240xf32>
    %140 = vector.extract_strided_slice %131 {offsets = [0, 0], sizes = [4, 16], strides = [1, 1]} : vector<4x256xf32> to vector<4x16xf32>
    %141 = tpu.concatenate %139, %140 in 1 : vector<4x240xf32>, vector<4x16xf32> -> vector<4x256xf32>
    %142 = vector.shape_cast %10 : vector<1x256xi1> to vector<1x256xi1>
    %143 = vector.broadcast %142 : vector<1x256xi1> to vector<4x256xi1>
    %144 = arith.select %143, %141, %138 : vector<4x256xi1>, vector<4x256xf32>
    %145 = vector.shape_cast %12 : vector<1x256xi1> to vector<1x256xi1>
    %146 = vector.broadcast %145 : vector<1x256xi1> to vector<4x256xi1>
    %147 = arith.select %146, %138, %141 : vector<4x256xi1>, vector<4x256xf32>
    %c0_41 = arith.constant 0 : index
    %c0_42 = arith.constant 0 : index
    %c0_43 = arith.constant 0 : index
    %148 = vector.load %arg5[%c0_41, %c0_42, %c0_43] : memref<9x4x4xf32, #tpu.memory_space<vmem>>, vector<1x4x4xf32>
    %149 = vector.shape_cast %148 : vector<1x4x4xf32> to vector<4x4xf32>
    %cst_44 = arith.constant dense<0.000000e+00> : vector<4x256xf32>
    %150 = tpu.matmul %149, %144, %cst_44 {dimension_numbers = #tpu.dot_dimension_numbers<[1], [0], [0], [1], [0, 0, 1, 1], [], []>} : vector<4x4xf32>, vector<4x256xf32>, vector<4x256xf32> -> vector<4x256xf32>
    %151 = arith.addf %135, %150 : vector<4x256xf32>
    %c3_45 = arith.constant 3 : index
    %c0_46 = arith.constant 0 : index
    %c0_47 = arith.constant 0 : index
    %152 = vector.load %arg5[%c3_45, %c0_46, %c0_47] : memref<9x4x4xf32, #tpu.memory_space<vmem>>, vector<1x4x4xf32>
    %153 = vector.shape_cast %152 : vector<1x4x4xf32> to vector<4x4xf32>
    %cst_48 = arith.constant dense<0.000000e+00> : vector<4x256xf32>
    %154 = tpu.matmul %153, %131, %cst_48 {dimension_numbers = #tpu.dot_dimension_numbers<[1], [0], [0], [1], [0, 0, 1, 1], [], []>} : vector<4x4xf32>, vector<4x256xf32>, vector<4x256xf32> -> vector<4x256xf32>
    %155 = arith.addf %151, %154 : vector<4x256xf32>
    %c6_49 = arith.constant 6 : index
    %c0_50 = arith.constant 0 : index
    %c0_51 = arith.constant 0 : index
    %156 = vector.load %arg5[%c6_49, %c0_50, %c0_51] : memref<9x4x4xf32, #tpu.memory_space<vmem>>, vector<1x4x4xf32>
    %157 = vector.shape_cast %156 : vector<1x4x4xf32> to vector<4x4xf32>
    %cst_52 = arith.constant dense<0.000000e+00> : vector<4x256xf32>
    %158 = tpu.matmul %157, %147, %cst_52 {dimension_numbers = #tpu.dot_dimension_numbers<[1], [0], [0], [1], [0, 0, 1, 1], [], []>} : vector<4x4xf32>, vector<4x256xf32>, vector<4x256xf32> -> vector<4x256xf32>
    %159 = arith.addf %155, %158 : vector<4x256xf32>
    %160 = vector.extract_strided_slice %122 {offsets = [0, 240], sizes = [4, 16], strides = [1, 1]} : vector<4x256xf32> to vector<4x16xf32>
    %161 = vector.extract_strided_slice %122 {offsets = [0, 0], sizes = [4, 240], strides = [1, 1]} : vector<4x256xf32> to vector<4x240xf32>
    %162 = tpu.concatenate %160, %161 in 1 : vector<4x16xf32>, vector<4x240xf32> -> vector<4x256xf32>
    %163 = vector.extract_strided_slice %122 {offsets = [0, 16], sizes = [4, 240], strides = [1, 1]} : vector<4x256xf32> to vector<4x240xf32>
    %164 = vector.extract_strided_slice %122 {offsets = [0, 0], sizes = [4, 16], strides = [1, 1]} : vector<4x256xf32> to vector<4x16xf32>
    %165 = tpu.concatenate %163, %164 in 1 : vector<4x240xf32>, vector<4x16xf32> -> vector<4x256xf32>
    %166 = vector.shape_cast %10 : vector<1x256xi1> to vector<1x256xi1>
    %167 = vector.broadcast %166 : vector<1x256xi1> to vector<4x256xi1>
    %168 = arith.select %167, %165, %162 : vector<4x256xi1>, vector<4x256xf32>
    %169 = vector.shape_cast %12 : vector<1x256xi1> to vector<1x256xi1>
    %170 = vector.broadcast %169 : vector<1x256xi1> to vector<4x256xi1>
    %171 = arith.select %170, %162, %165 : vector<4x256xi1>, vector<4x256xf32>
    %c1_53 = arith.constant 1 : index
    %c0_54 = arith.constant 0 : index
    %c0_55 = arith.constant 0 : index
    %172 = vector.load %arg5[%c1_53, %c0_54, %c0_55] : memref<9x4x4xf32, #tpu.memory_space<vmem>>, vector<1x4x4xf32>
    %173 = vector.shape_cast %172 : vector<1x4x4xf32> to vector<4x4xf32>
    %cst_56 = arith.constant dense<0.000000e+00> : vector<4x256xf32>
    %174 = tpu.matmul %173, %168, %cst_56 {dimension_numbers = #tpu.dot_dimension_numbers<[1], [0], [0], [1], [0, 0, 1, 1], [], []>} : vector<4x4xf32>, vector<4x256xf32>, vector<4x256xf32> -> vector<4x256xf32>
    %175 = arith.addf %159, %174 : vector<4x256xf32>
    %c4_57 = arith.constant 4 : index
    %c0_58 = arith.constant 0 : index
    %c0_59 = arith.constant 0 : index
    %176 = vector.load %arg5[%c4_57, %c0_58, %c0_59] : memref<9x4x4xf32, #tpu.memory_space<vmem>>, vector<1x4x4xf32>
    %177 = vector.shape_cast %176 : vector<1x4x4xf32> to vector<4x4xf32>
    %cst_60 = arith.constant dense<0.000000e+00> : vector<4x256xf32>
    %178 = tpu.matmul %177, %122, %cst_60 {dimension_numbers = #tpu.dot_dimension_numbers<[1], [0], [0], [1], [0, 0, 1, 1], [], []>} : vector<4x4xf32>, vector<4x256xf32>, vector<4x256xf32> -> vector<4x256xf32>
    %179 = arith.addf %175, %178 : vector<4x256xf32>
    %c7_61 = arith.constant 7 : index
    %c0_62 = arith.constant 0 : index
    %c0_63 = arith.constant 0 : index
    %180 = vector.load %arg5[%c7_61, %c0_62, %c0_63] : memref<9x4x4xf32, #tpu.memory_space<vmem>>, vector<1x4x4xf32>
    %181 = vector.shape_cast %180 : vector<1x4x4xf32> to vector<4x4xf32>
    %cst_64 = arith.constant dense<0.000000e+00> : vector<4x256xf32>
    %182 = tpu.matmul %181, %171, %cst_64 {dimension_numbers = #tpu.dot_dimension_numbers<[1], [0], [0], [1], [0, 0, 1, 1], [], []>} : vector<4x4xf32>, vector<4x256xf32>, vector<4x256xf32> -> vector<4x256xf32>
    %183 = arith.addf %179, %182 : vector<4x256xf32>
    %184 = vector.extract_strided_slice %134 {offsets = [0, 240], sizes = [4, 16], strides = [1, 1]} : vector<4x256xf32> to vector<4x16xf32>
    %185 = vector.extract_strided_slice %134 {offsets = [0, 0], sizes = [4, 240], strides = [1, 1]} : vector<4x256xf32> to vector<4x240xf32>
    %186 = tpu.concatenate %184, %185 in 1 : vector<4x16xf32>, vector<4x240xf32> -> vector<4x256xf32>
    %187 = vector.extract_strided_slice %134 {offsets = [0, 16], sizes = [4, 240], strides = [1, 1]} : vector<4x256xf32> to vector<4x240xf32>
    %188 = vector.extract_strided_slice %134 {offsets = [0, 0], sizes = [4, 16], strides = [1, 1]} : vector<4x256xf32> to vector<4x16xf32>
    %189 = tpu.concatenate %187, %188 in 1 : vector<4x240xf32>, vector<4x16xf32> -> vector<4x256xf32>
    %190 = vector.shape_cast %10 : vector<1x256xi1> to vector<1x256xi1>
    %191 = vector.broadcast %190 : vector<1x256xi1> to vector<4x256xi1>
    %192 = arith.select %191, %189, %186 : vector<4x256xi1>, vector<4x256xf32>
    %193 = vector.shape_cast %12 : vector<1x256xi1> to vector<1x256xi1>
    %194 = vector.broadcast %193 : vector<1x256xi1> to vector<4x256xi1>
    %195 = arith.select %194, %186, %189 : vector<4x256xi1>, vector<4x256xf32>
    %c2_65 = arith.constant 2 : index
    %c0_66 = arith.constant 0 : index
    %c0_67 = arith.constant 0 : index
    %196 = vector.load %arg5[%c2_65, %c0_66, %c0_67] : memref<9x4x4xf32, #tpu.memory_space<vmem>>, vector<1x4x4xf32>
    %197 = vector.shape_cast %196 : vector<1x4x4xf32> to vector<4x4xf32>
    %cst_68 = arith.constant dense<0.000000e+00> : vector<4x256xf32>
    %198 = tpu.matmul %197, %192, %cst_68 {dimension_numbers = #tpu.dot_dimension_numbers<[1], [0], [0], [1], [0, 0, 1, 1], [], []>} : vector<4x4xf32>, vector<4x256xf32>, vector<4x256xf32> -> vector<4x256xf32>
    %199 = arith.addf %183, %198 : vector<4x256xf32>
    %c5_69 = arith.constant 5 : index
    %c0_70 = arith.constant 0 : index
    %c0_71 = arith.constant 0 : index
    %200 = vector.load %arg5[%c5_69, %c0_70, %c0_71] : memref<9x4x4xf32, #tpu.memory_space<vmem>>, vector<1x4x4xf32>
    %201 = vector.shape_cast %200 : vector<1x4x4xf32> to vector<4x4xf32>
    %cst_72 = arith.constant dense<0.000000e+00> : vector<4x256xf32>
    %202 = tpu.matmul %201, %134, %cst_72 {dimension_numbers = #tpu.dot_dimension_numbers<[1], [0], [0], [1], [0, 0, 1, 1], [], []>} : vector<4x4xf32>, vector<4x256xf32>, vector<4x256xf32> -> vector<4x256xf32>
    %203 = arith.addf %199, %202 : vector<4x256xf32>
    %c8_73 = arith.constant 8 : index
    %c0_74 = arith.constant 0 : index
    %c0_75 = arith.constant 0 : index
    %204 = vector.load %arg5[%c8_73, %c0_74, %c0_75] : memref<9x4x4xf32, #tpu.memory_space<vmem>>, vector<1x4x4xf32>
    %205 = vector.shape_cast %204 : vector<1x4x4xf32> to vector<4x4xf32>
    %cst_76 = arith.constant dense<0.000000e+00> : vector<4x256xf32>
    %206 = tpu.matmul %205, %195, %cst_76 {dimension_numbers = #tpu.dot_dimension_numbers<[1], [0], [0], [1], [0, 0, 1, 1], [], []>} : vector<4x4xf32>, vector<4x256xf32>, vector<4x256xf32> -> vector<4x256xf32>
    %207 = arith.addf %203, %206 : vector<4x256xf32>
    %cst_77 = arith.constant dense<0.000000e+00> : vector<4xf32>
    %208 = vector.multi_reduction <add>, %207, %cst_77 [1] : vector<4x256xf32> to vector<4xf32>
    %209 = vector.shape_cast %208 : vector<4xf32> to vector<4x1xf32>
    %210 = arith.mulf %207, %207 : vector<4x256xf32>
    %cst_78 = arith.constant dense<0.000000e+00> : vector<4xf32>
    %211 = vector.multi_reduction <add>, %210, %cst_78 [1] : vector<4x256xf32> to vector<4xf32>
    %212 = vector.shape_cast %211 : vector<4xf32> to vector<4x1xf32>
    %cst_79 = arith.constant 3.906250e-03 : f32
    %213 = vector.broadcast %cst_79 : f32 to vector<4x1xf32>
    %214 = arith.mulf %209, %213 : vector<4x1xf32>
    %cst_80 = arith.constant 3.906250e-03 : f32
    %215 = vector.broadcast %cst_80 : f32 to vector<4x1xf32>
    %216 = arith.mulf %212, %215 : vector<4x1xf32>
    %217 = arith.mulf %214, %214 : vector<4x1xf32>
    %218 = arith.subf %216, %217 : vector<4x1xf32>
    %c0_81 = arith.constant 0 : index
    %c0_82 = arith.constant 0 : index
    %219 = vector.load %arg6[%c0_81, %c0_82] : memref<4x1xf32, #tpu.memory_space<vmem>>, vector<4x1xf32>
    %cst_83 = arith.constant 9.99999974E-6 : f32
    %220 = vector.broadcast %cst_83 : f32 to vector<4x1xf32>
    %221 = arith.addf %218, %220 : vector<4x1xf32>
    %222 = math.rsqrt %221 : vector<4x1xf32>
    %223 = arith.mulf %219, %222 : vector<4x1xf32>
    %c0_84 = arith.constant 0 : index
    %c0_85 = arith.constant 0 : index
    %224 = vector.load %arg7[%c0_84, %c0_85] : memref<4x1xf32, #tpu.memory_space<vmem>>, vector<4x1xf32>
    %225 = arith.mulf %214, %223 : vector<4x1xf32>
    %226 = arith.subf %224, %225 : vector<4x1xf32>
    %227 = vector.broadcast %223 : vector<4x1xf32> to vector<4x256xf32>
    %228 = arith.mulf %207, %227 : vector<4x256xf32>
    %229 = vector.broadcast %226 : vector<4x1xf32> to vector<4x256xf32>
    %230 = arith.addf %228, %229 : vector<4x256xf32>
    %231 = arith.addf %1, %230 : vector<4x256xf32>
    %c0_86 = arith.constant 0 : index
    %c0_87 = arith.constant 0 : index
    %c0_88 = arith.constant 0 : index
    %232 = vector.load %arg8[%c0_86, %c0_87, %c0_88] : memref<1x4x256xf32, #tpu.memory_space<vmem>>, vector<1x4x256xf32>
    %233 = vector.shape_cast %232 : vector<1x4x256xf32> to vector<4x256xf32>
    %234 = vector.shape_cast %231 : vector<4x256xf32> to vector<1x4x256xf32>
    tpu.vector_store %arg8[%c0_86, %c0_87, %c0_88], %234 {strides = array<i32>} : memref<1x4x256xf32, #tpu.memory_space<vmem>>, vector<1x4x256xf32>,
    return
  }
  func.func @transform_0(%arg0: i32) -> (i32, i32, i32) {
    %c0_i32 = arith.constant 0 : i32
    %c0_i32_0 = arith.constant 0 : i32
    %c0_i32_1 = arith.constant 0 : i32
    return %arg0, %c0_i32, %c0_i32_0 : i32, i32, i32
  }
  func.func @transform_1(%arg0: i32) -> (i32, i32, i32) {
    %c0_i32 = arith.constant 0 : i32
    %c0_i32_0 = arith.constant 0 : i32
    %c0_i32_1 = arith.constant 0 : i32
    %c0_i32_2 = arith.constant 0 : i32
    return %c0_i32, %c0_i32_0, %c0_i32_1 : i32, i32, i32
  }
  func.func @transform_2(%arg0: i32) -> (i32, i32) {
    %c0_i32 = arith.constant 0 : i32
    %c0_i32_0 = arith.constant 0 : i32
    %c0_i32_1 = arith.constant 0 : i32
    return %c0_i32, %c0_i32_0 : i32, i32
  }
  func.func @transform_3(%arg0: i32) -> (i32, i32) {
    %c0_i32 = arith.constant 0 : i32
    %c0_i32_0 = arith.constant 0 : i32
    %c0_i32_1 = arith.constant 0 : i32
    return %c0_i32, %c0_i32_0 : i32, i32
  }
  func.func @transform_4(%arg0: i32) -> (i32, i32, i32) {
    %c0_i32 = arith.constant 0 : i32
    %c0_i32_0 = arith.constant 0 : i32
    %c0_i32_1 = arith.constant 0 : i32
    %c0_i32_2 = arith.constant 0 : i32
    return %c0_i32, %c0_i32_0, %c0_i32_1 : i32, i32, i32
  }
  func.func @transform_5(%arg0: i32) -> (i32, i32) {
    %c0_i32 = arith.constant 0 : i32
    %c0_i32_0 = arith.constant 0 : i32
    %c0_i32_1 = arith.constant 0 : i32
    return %c0_i32, %c0_i32_0 : i32, i32
  }
  func.func @transform_6(%arg0: i32) -> (i32, i32) {
    %c0_i32 = arith.constant 0 : i32
    %c0_i32_0 = arith.constant 0 : i32
    %c0_i32_1 = arith.constant 0 : i32
    return %c0_i32, %c0_i32_0 : i32, i32
  }
  func.func @transform_7(%arg0: i32) -> (i32, i32, i32) {
    %c0_i32 = arith.constant 0 : i32
    %c0_i32_0 = arith.constant 0 : i32
    %c0_i32_1 = arith.constant 0 : i32
    return %arg0, %c0_i32, %c0_i32_0 : i32, i32, i32
  }
}

</mosaic_0001>

<bundles_post_ra>
// kernel: tpu_custom_call.1
= control target key start
LH: loop header
LB: loop body
LE: loop exit
PB: predicated region body
PF: predicated region fallthrough
CT: control target
= control target key end

     0   :  { %12 = vsyncpa [#allocation3], 0  ;;  %s3577_s0 = inlined_call_operand.hbm [shape: f32[2,4,256], index: 0, kind: input, shape index: {}]   ;;  %s3578_s1 = inlined_call_operand.hbm [shape: f32[9,4,4], index: 1, kind: input, shape index: {}]   ;;  %s3579_s2 = inlined_call_operand.hbm [shape: f32[4,1], index: 2, kind: input, shape index: {}]   ;;  %s3580_s3 = inlined_call_operand.hbm [shape: f32[4,1], index: 3, kind: input, shape index: {}]   ;;  %s3581_s4 = inlined_call_operand.hbm [shape: f32[9,4,4], index: 4, kind: input, shape index: {}]   ;;  %s3582_s5 = inlined_call_operand.hbm [shape: f32[4,1], index: 5, kind: input, shape index: {}]   ;;  %s3583_s6 = inlined_call_operand.hbm [shape: f32[4,1], index: 6, kind: input, shape index: {}]   ;;  %s3584_s7 = inlined_call_operand.hbm [shape: f32[2,4,256], index: 7, kind: output, shape index: {}]  }
   0x1   :  { %14 = vsyncpa [#allocation3 + $0x1], 0 }
   0x2   :  { %15 = vsyncpa [#allocation6], 0 }
   0x3   :  { %16 = vsyncpa [#allocation9], 0 }
   0x4   :  { %17 = vsyncpa [#allocation12], 0 }
   0x5   :  { %18 = vsyncpa [#allocation4], 0 }
   0x6   :  { %20 = vsyncpa [#allocation4 + $0x1], 0  ;;  %s2975_s24 = smov 0   ;;  %s2977_s25 = smov 0  }
   0x7   :  { %s2979_s26 = smov 0   ;;  %s2981_s27 = smov 0  }
   0x8 LB: > { %s2912_s28 = smov [#allocation5]   ;;  %s2996_s30 = sadd.s32 4294967295, %s2910_s27   ;;  %s2910_s27 = sphi %s2981_s27, %s3612_s27   ;;  %s2906_s26 = sphi %s2979_s26, %s3611_s26   ;;  %s2902_s25 = sphi %s2977_s25, %s3610_s25   ;;  %s2898_s24 = sphi %s2975_s24, %s3609_s24  }
   0x9   : > { %s221_s29 = sshll.u32 %s2912_s28, 4  ;;  %p2388_p0 = scmp.ge.s32.totalorder %s2910_s27, 1  ;;  %s3001_s29 = int_to_ptr.vmem [resolvable:$true] %s221_s29 }
   0xa   : > { %p3585_p1 = scmp.eq.s32.totalorder %s2996_s30, 0  ;;  %p209_p2 = scmp.lt.s32.totalorder %s2910_s27, 3 }
   0xb   : > { %s2913_s9 = smov [#allocation8]   ;;  %s2914_s12 = smov [#allocation11]  }
   0xc   : > { %p3003_p3 = pnand %p2388_p0, %p209_p2  ;;  %s246_s10 = sshll.u32 %s2913_s9, 4  ;;  %s3016_s10 = int_to_ptr.vmem [resolvable:$true] %s246_s10 }
   0xd   : > { %s270_s13 = sshll.u32 %s2914_s12, 4  ;;  %s2630_s16 = scalar_lea.hbm %s3578_s1, 576  ;;  %s3018_s13 = int_to_ptr.vmem [resolvable:$true] %s270_s13 }
   0xe   : > { %s3588_s8 = scalar_select %p3003_p3, 1, 0 }
   0xf   : > { %p2529_p5 = pneg %p3003_p3  ;;  %p2631_p7 = scmp.ne.s32.totalorder %s3578_s1, %s2630_s16 }
  0x10   : > { %p2637_p11 = scmp.lt.u32.totalorder %s2630_s16, %s3578_s1 }
  0x11   : > { %p3012_p6 = pnand %p2529_p5, %p3585_p1 }
  0x13   : > { %p3028_p8 = pneg %p3012_p6 }
  0x15   : > { %p2633_p9 = pnand %p3028_p8, %p2631_p7 }
  0x17   : > { %p2634_p10 = pneg %p2633_p9 }
  0x19   : > { %p2639_p12 = pnand %p2637_p11, %p2634_p10 }
  0x1b   : > { %2642 = shalt.err (!%p2639_p12)
}
  0x1c   : > { %s2643_s22 = scalar_lea.vmem %s3001_s29, 576  ;;  %p2651_p5 = scmp.lt.s32.totalorder %s3001_s29, %s3001_s29 }
  0x1d   : > { %p2644_p13 = scmp.ne.s32.totalorder %s3001_s29, %s2643_s22  ;;  %p2652_p4 = scmp.lt.s32.totalorder %s2643_s22, %s2643_s22 }
  0x1f   : > { %p2646_p0 = pnand %p2644_p13, %p3028_p8  ;;  %p2653_p7 = por %p2652_p4, %p2651_p5 }
  0x21   : > { %p2647_p2 = pneg %p2646_p0 }
  0x23   : > { %p2654_p9 = pnand %p2653_p7, %p2647_p2 }
  0x25   : > { %2657 = shalt.err (!%p2654_p9)
}
  0x26   : > { %s2915_s23 = smov 64   ;;  %s2916_s28 = smov 4  }
  0x27   : > { %2532 = dma.hbm_to_vmem [thread:$0]  (!%p3012_p6), %s3578_s1, 576, %s3001_s29, [#allocation6], %s2915_s23, %s2915_s23, %s2916_s28  }
  0x28   : > { %s2658_s16 = scalar_lea.hbm %s3580_s3, 64 }
  0x29   : > { %p2659_p4 = scmp.ne.s32.totalorder %s3580_s3, %s2658_s16  ;;  %p2665_p12 = scmp.lt.u32.totalorder %s2658_s16, %s3580_s3 }
  0x2b   : > { %p2661_p10 = pnand %p2659_p4, %p3028_p8 }
  0x2d   : > { %p2662_p11 = pneg %p2661_p10 }
  0x2f   : > { %p2667_p13 = pnand %p2665_p12, %p2662_p11 }
  0x31   : > { %2670 = shalt.err (!%p2667_p13)
}
  0x32   : > { %s2671_s29 = scalar_lea.vmem %s3016_s10, 64  ;;  %p2679_p7 = scmp.lt.s32.totalorder %s3016_s10, %s3016_s10 }
  0x33   : > { %p2672_p0 = scmp.ne.s32.totalorder %s3016_s10, %s2671_s29  ;;  %p2680_p9 = scmp.lt.s32.totalorder %s2671_s29, %s2671_s29 }
  0x35   : > { %p2674_p2 = pnand %p2672_p0, %p3028_p8  ;;  %p2681_p4 = por %p2680_p9, %p2679_p7 }
  0x37   : > { %p2675_p5 = pneg %p2674_p2 }
  0x39   : > { %p2682_p10 = pnand %p2681_p4, %p2675_p5 }
  0x3b   : > { %2685 = shalt.err (!%p2682_p10)
}
  0x3c   : > { %2538 = dma.hbm_to_vmem [thread:$0]  (!%p3012_p6), %s3580_s3, 64, %s3016_s10, [#allocation9]  }
  0x3d   : > { %s2686_s15 = scalar_lea.hbm %s3582_s5, 64 }
  0x3e   : > { %p2687_p11 = scmp.ne.s32.totalorder %s3582_s5, %s2686_s15  ;;  %p2693_p0 = scmp.lt.u32.totalorder %s2686_s15, %s3582_s5 }
  0x40   : > { %p2689_p12 = pnand %p2687_p11, %p3028_p8 }
  0x42   : > { %p2690_p13 = pneg %p2689_p12 }
  0x44   : > { %p2695_p2 = pnand %p2693_p0, %p2690_p13 }
  0x46   : > { %2698 = shalt.err (!%p2695_p2)
}
  0x47   : > { %s2699_s10 = scalar_lea.vmem %s3018_s13, 64  ;;  %p2707_p4 = scmp.lt.s32.totalorder %s3018_s13, %s3018_s13 }
  0x48   : > { %p2700_p5 = scmp.ne.s32.totalorder %s3018_s13, %s2699_s10  ;;  %p2708_p10 = scmp.lt.s32.totalorder %s2699_s10, %s2699_s10 }
  0x4a   : > { %p2702_p7 = pnand %p2700_p5, %p3028_p8  ;;  %p2709_p11 = por %p2708_p10, %p2707_p4 }
  0x4c   : > { %p2703_p9 = pneg %p2702_p7 }
  0x4e   : > { %p2710_p12 = pnand %p2709_p11, %p2703_p9 }
  0x50   : > { %2713 = shalt.err (!%p2710_p12)
}
  0x51   : > { %2544 = dma.hbm_to_vmem [thread:$0]  (!%p3012_p6), %s3582_s5, 64, %s3018_s13, [#allocation12]  }
  0x52   : > { %s2917_s22 = smov [#allocation7]   ;;  %s2918_s12 = smov [#allocation10]  }
  0x53   : > { %s235_s9 = sshll.u32 %s2917_s22, 4  ;;  %s256_s14 = sshll.u32 %s2918_s12, 4  ;;  %s236_s9 = int_to_ptr.vmem [resolvable:$true] %s235_s9  ;;  %s257_s14 = int_to_ptr.vmem [resolvable:$true] %s256_s14 }
  0x54   : > { %s2714_s17 = scalar_lea.hbm %s3579_s2, 64 }
  0x55   : > { %p2715_p13 = scmp.ne.s32.totalorder %s3579_s2, %s2714_s17  ;;  %p2721_p5 = scmp.lt.u32.totalorder %s2714_s17, %s3579_s2 }
  0x57   : > { %p2717_p0 = pnand %p2715_p13, %p3028_p8 }
  0x59   : > { %p2718_p2 = pneg %p2717_p0 }
  0x5b   : > { %p2723_p7 = pnand %p2721_p5, %p2718_p2 }
  0x5d   : > { %2726 = shalt.err (!%p2723_p7)
}
  0x5e   : > { %s2727_s13 = scalar_lea.vmem %s236_s9, 64  ;;  %p2735_p11 = scmp.lt.s32.totalorder %s236_s9, %s236_s9 }
  0x5f   : > { %p2728_p9 = scmp.ne.s32.totalorder %s236_s9, %s2727_s13  ;;  %p2736_p12 = scmp.lt.s32.totalorder %s2727_s13, %s2727_s13 }
  0x61   : > { %p2730_p4 = pnand %p2728_p9, %p3028_p8  ;;  %p2737_p1 = por %p2736_p12, %p2735_p11 }
  0x63   : > { %p2731_p10 = pneg %p2730_p4 }
  0x65   : > { %p2738_p3 = pnand %p2737_p1, %p2731_p10 }
  0x67   : > { %2741 = shalt.err (!%p2738_p3)
}
  0x68   : > { %2535 = dma.hbm_to_vmem [thread:$0]  (!%p3012_p6), %s3579_s2, 64, %s236_s9, [#allocation6]  }
  0x69   : > { %s2742_s16 = scalar_lea.hbm %s3581_s4, 576 }
  0x6a   : > { %p2743_p13 = scmp.ne.s32.totalorder %s3581_s4, %s2742_s16  ;;  %p2749_p3 = scmp.lt.u32.totalorder %s2742_s16, %s3581_s4 }
  0x6c   : > { %p2745_p0 = pnand %p2743_p13, %p3028_p8 }
  0x6e   : > { %p2746_p1 = pneg %p2745_p0 }
  0x70   : > { %p2751_p2 = pnand %p2749_p3, %p2746_p1 }
  0x72   : > { %2754 = shalt.err (!%p2751_p2)
}
  0x73   : > { %s2755_s21 = scalar_lea.vmem %s257_s14, 576  ;;  %p2763_p4 = scmp.lt.s32.totalorder %s257_s14, %s257_s14 }
  0x74   : > { %p2756_p5 = scmp.ne.s32.totalorder %s257_s14, %s2755_s21  ;;  %p2764_p10 = scmp.lt.s32.totalorder %s2755_s21, %s2755_s21 }
  0x76   : > { %p2758_p7 = pnand %p2756_p5, %p3028_p8  ;;  %p2765_p11 = por %p2764_p10, %p2763_p4 }
  0x78   : > { %p2759_p9 = pneg %p2758_p7 }
  0x7a   : > { %p2766_p12 = pnand %p2765_p11, %p2759_p9 }
  0x7c   : > { %2769 = shalt.err (!%p2766_p12)
}
  0x7d   : > { %2541 = dma.hbm_to_vmem [thread:$0]  (!%p3012_p6), %s3581_s4, 576, %s257_s14, [#allocation9], %s2915_s23, %s2915_s23, %s2916_s28  }
  0x7e   : > { %s2919_s29 = smov [#allocation13]   ;;  %s2770_s16 = scalar_lea.hbm %s3583_s6, 64 }
  0x7f   : > { %s281_s22 = sshll.u32 %s2919_s29, 4  ;;  %p2771_p13 = scmp.ne.s32.totalorder %s3583_s6, %s2770_s16  ;;  %s282_s22 = int_to_ptr.vmem [resolvable:$true] %s281_s22 }
  0x80   : > { %p2777_p3 = scmp.lt.u32.totalorder %s2770_s16, %s3583_s6 }
  0x81   : > { %p2773_p0 = pnand %p2771_p13, %p3028_p8 }
  0x83   : > { %p2774_p1 = pneg %p2773_p0 }
  0x85   : > { %p2779_p2 = pnand %p2777_p3, %p2774_p1 }
  0x87   : > { %2782 = shalt.err (!%p2779_p2)
}
  0x88   : > { %s2783_s23 = scalar_lea.vmem %s282_s22, 64  ;;  %p2791_p4 = scmp.lt.s32.totalorder %s282_s22, %s282_s22 }
  0x89   : > { %p2784_p5 = scmp.ne.s32.totalorder %s282_s22, %s2783_s23  ;;  %p2792_p10 = scmp.lt.s32.totalorder %s2783_s23, %s2783_s23 }
  0x8b   : > { %p2786_p7 = pnand %p2784_p5, %p3028_p8  ;;  %p2793_p11 = por %p2792_p10, %p2791_p4 }
  0x8d   : > { %p2787_p9 = pneg %p2786_p7 }
  0x8f   : > { %p2794_p12 = pnand %p2793_p11, %p2787_p9 }
  0x91   : > { %2797 = shalt.err (!%p2794_p12)
}
  0x92   : > { %2547 = dma.hbm_to_vmem [thread:$0]  (!%p3012_p6), %s3583_s6, 64, %s282_s22, [#allocation12]  }
  0x93   : > { %s2387_s19 = sadd.s32 4294967294, %s2910_s27   ;;  %s3157_s11 = sadd.s32 1, %s2910_s27  }
  0x94   : > { %s30_s21 = ssub.s32 %s2910_s27, %s3157_s11  ;;  %s33_s9 = sadd.s32 1, %s2906_s26 }
  0x95   : > { %p31_p8 = scmp.eq.s32.totalorder %s30_s21, 0  ;;  %p40_p13 = scmp.ne.s32.totalorder %s2906_s26, %s2902_s25 }
  0x96   : > { %p41_p0 = scmp.eq.s32.totalorder %s2910_s27, 0  ;;  %p46_p1 = scmp.ne.s32.totalorder %s2902_s25, %s2898_s24 }
  0x97   : > { %s3168_s13 = scalar_select %p31_p8, %s2906_s26, %s33_s9  }
  0x98   : > { %p3170_p3 = por %p41_p0, %p40_p13  ;;  %p3592_p2 = scmp.eq.s32.totalorder %s2996_s30, 0 }
  0x99   : > { %p196_p5 = scmp.eq.s32.totalorder %s2996_s30, 1  ;;  %p202_p7 = scmp.eq.s32.totalorder %s2387_s19, 1 }
  0x9a   : > { %p3176_p6 = por %p3592_p2, %p46_p1  ;;  %p2562_p9 = scmp.lt.s32.totalorder %s2910_s27, 2 }
  0x9b   : > { %s292_s12 = sand.u32 1, %s2906_s26   ;;  %p3183_p4 = por %p196_p5, %p40_p13 }
  0x9c   : > { %p3187_p10 = por %p202_p7, %p46_p1  ;;  %s2396_s17 = sshll.u32 %s292_s12, 3 }
  0x9d   : > { %s3594_s15 = scalar_select %p3183_p4, 1, 0 }
  0x9e   : > { %s3595_s16 = scalar_select %p3187_p10, 1, 0 }
  0x9f   : > { %s2467_s18 = sshll.u32 %s2910_s27, 7  ;;  %s296_s28 = scalar_lea.vmem [#allocation2], %s2396_s17 }
  0xa0   : > { %s3195_s23 = scalar_lea.hbm %s3577_s0, %s2467_s18  ;;  %s304_s14 = sshll.u32 %s296_s28, 4  ;;  %s3197_s14 = int_to_ptr.vmem [resolvable:$true] %s304_s14 }
  0xa1   : > { %p3201_p11 = pnand %p2562_p9, %p3170_p3  ;;  %s293_s21 = scalar_lea.sflag [#allocation3], %s292_s12 }
  0xa2   : > { %s2798_s9 = scalar_lea.hbm %s3195_s23, 128  ;;  %s2803_s20 = scalar_lea.hbm %s3577_s0, 256 }
  0xa3   : > { %p2799_p12 = scmp.ne.s32.totalorder %s3195_s23, %s2798_s9  ;;  %p2800_p8 = pneg %p3201_p11 }
  0xa4   : > { %p2804_p1 = scmp.lt.u32.totalorder %s3195_s23, %s3577_s0  ;;  %p2805_p3 = scmp.lt.u32.totalorder %s2803_s20, %s2798_s9 }
  0xa5   : > { %p2801_p13 = pnand %p2800_p8, %p2799_p12  ;;  %p2807_p5 = scmp.lt.u32.totalorder %s2798_s9, %s3195_s23 }
  0xa6   : > { %p2806_p2 = por %p2805_p3, %p2804_p1 }
  0xa7   : > { %p2802_p0 = pneg %p2801_p13 }
  0xa8   : > { %p2808_p7 = por %p2807_p5, %p2806_p2 }
  0xaa   : > { %p2809_p9 = pnand %p2808_p7, %p2802_p0 }
  0xac   : > { %2812 = shalt.err (!%p2809_p9)
}
  0xad   : > { %s2813_s12 = scalar_lea.vmem %s3197_s14, 128  ;;  %s2920_s28 = smov [#allocation2]  }
  0xae   : > { %p2814_p12 = scmp.ne.s32.totalorder %s3197_s14, %s2813_s12  ;;  %s2818_s17 = sshll.u32 %s2920_s28, 4  ;;  %s2819_s17 = int_to_ptr.vmem [resolvable:$false] %s2818_s17 }
  0xaf   : > { %s2820_s18 = scalar_lea.vmem %s2819_s17, 256  ;;  %p2821_p4 = scmp.lt.s32.totalorder %s3197_s14, %s2819_s17 }
  0xb0   : > { %p2816_p13 = pnand %p2814_p12, %p2800_p8  ;;  %p2822_p1 = scmp.lt.s32.totalorder %s2820_s18, %s2813_s12 }
  0xb2   : > { %p2817_p10 = pneg %p2816_p13  ;;  %p2823_p3 = por %p2822_p1, %p2821_p4 }
  0xb4   : > { %p2824_p2 = pnand %p2823_p3, %p2817_p10 }
  0xb6   : > { %2827 = shalt.err (!%p2824_p2)
}
  0xb7   : > { %2551 = dma.hbm_to_vmem [thread:$0]  (!%p3201_p11), %s3195_s23, 128, %s3197_s14, %s293_s21  }
  0xb8   : > { %p3597_p0 = scmp.ne.s32.totalorder %s3588_s8, 0 }
  0xb9   : > { %s3233_s9 = sand.u32 (!%p3597_p0), 1, %s2902_s25  }
  0xba   : > { %313 = sbr.rel (%p3597_p0) target bundleno = 1889 (0x761), region = 48  ;;  %s2400_s20 = sshll.u32 (!%p3597_p0), %s3233_s9, 3 }
  0xbb   : > { %s316_s29 = scalar_lea.sflag (!%p3597_p0), [#allocation3], %s3233_s9  ;;  %s3239_s10 = scalar_lea.vmem (!%p3597_p0), [#allocation2], %s2400_s20 }
  0xc1   : > { %2873 = dma.done.wait (%p3176_p6), %s316_s29, 128  }
  0xc2   : > { %2875 = vsyncadd (%p3176_p6), %s316_s29, 4294967168  ;;  %p3598_p4 = scmp.eq.s32.totalorder %s2996_s30, 0 }
  0xc4   : > { %2877 = dma.done.wait (%p3598_p4), [#allocation6], 640   ;;  %p3599_p10 = pmov %p3598_p4 }
  0xc5   : > { %p3600_p11 = pmov %p3598_p4 }
  0xc6   : > { %2879 = vsyncadd (%p3599_p10), [#allocation6], 4294966656 }
  0xc7   : > { %2881 = dma.done.wait (%p3600_p11), [#allocation9], 640   ;;  %p3601_p8 = pmov %p3598_p4 }
  0xc8   : > { %p3602_p5 = pmov %p3598_p4 }
  0xc9   : > { %2883 = vsyncadd (%p3601_p8), [#allocation9], 4294966656 }
  0xca   : > { %2885 = dma.done.wait (%p3602_p5), [#allocation12], 64   ;;  %p3603_p7 = pmov %p3598_p4 }
  0xcb   : > { %v375_v0 = vlaneseq  ;;  %v2921_v1 = vmov 1983009808   ;;  %v2922_v3 = vmov 1934713408   ;;  %p3604_p6 = pmov %p3598_p4 }
  0xcc   : > { %2887 = vsyncadd (%p3603_p7), [#allocation12], 4294967232  ;;  %v379_v2 = vunpack.c.l.s4 %v2921_v1  ;;  %v394_v4 = vunpack.c.l.s4 %v2922_v3 }
  0xcd   : > { %2889 = dma.done.wait (%p3604_p6), [#allocation12], 64   ;;  %p3605_p9 = pmov %p3598_p4 }
  0xce   : > { %v2923_v5 = vmov 0   ;;  %v3263_v6 = vand.u32 127, %v375_v0  ;;  %v3265_v7 = vshrl.u32 %v375_v0, 7  ;;  %v380_v8 = vunpack.c.0.s8 %v379_v2  ;;  %s2924_s8 = smov 64   ;;  %s2925_s22 = smov 16   ;;  %v3278_v23 = vld [vmem:[%s3239_s10] sm:$0xff] }
  0xcf   : > { %2891 = vsyncadd (%p3605_p9), [#allocation12], 4294967232  ;;  %2623 = vset.pattern.permute.xlu0 %v2923_v5  ;;  %2624 = vset.pattern.permute.xlu1 %v2923_v5  ;;  %v395_v9 = vunpack.c.0.s8 %v394_v4  ;;  %s2926_s23 = smov 48   ;;  %s2927_s14 = smov 32   ;;  %v3283_v25 = vcombine.high %v3278_v23, %v3278_v23  ;;  %v2933_v27 = vmov 0.0   ;;  %vm440_vm0 = vcmask 130048  }
  0xd0   : > { %v377_v10 = vcombine.high %v3263_v6, %v2923_v5  ;;  %v383_v11 = vsub.s32 %v380_v8, %v3265_v7  ;;  %s2928_s19 = smov 96   ;;  %s2929_s21 = smov 80   ;;  %607 = vmatprep.mubr.f32.mxu0 %v2933_v27  ;;  %1485 = vmatprep.mubr.f32.mxu1 %v2933_v27  ;;  %vm442_vm1 = vcmask 261120   ;;  %vm444_vm2 = vcmask 392192   ;;  %v533_v55 = vld [vmem:[#allocation5 + $0xc] sm:$0xf] }
  0xd1   : > { %v398_v12 = vsub.s32 %v395_v9, %v3265_v7  ;;  %s2930_s12 = smov 1   ;;  %s2931_s28 = smov 112   ;;  %vm446_vm3 = vcmask 523264   ;;  %vm448_vm4 = vcmask 654336   ;;  %vm450_vm5 = vcmask 785408  }
  0xd2   : > { %v384_v13 = vrot.slane %v3263_v6, %v383_v11  ;;  %v391_v14 = vrot.slane %v377_v10, %v383_v11  ;;  %s2932_s17 = smov 127   ;;  %vm452_vm6 = vcmask 916480   ;;  %v486_v42 = vsub.s32 0, %v3265_v7  ;;  %s2468_s18 = sshll.u32 %s2996_s30, 7 }
  0xd3   : > { %vm468_vm8 = vcmask 7168   ;;  %vm477_vm9 = vcmask 1039360   ;;  %vm538_vm10 = vcmask 1043456   ;;  %vm534_vm12 = vcmask 31744   ;;  %s373_s29 = scalar_lea.vmem [#allocation14], %s2400_s20  ;;  %p3606_p13 = scmp.ne.s32.totalorder %s3594_s15, 0 }
  0xd4   : > { %v399_v15 = vrot.slane %v384_v13, %v398_v12  ;;  %v414_v16 = vrot.slane %v391_v14, %v398_v12  ;;  %v392_v17 = vcombine.high %v384_v13, %v2923_v5  ;;  %v407_v19 = vcombine.high %v391_v14, %v2923_v5  ;;  %s2260_s10 = sshll.u32 %s373_s29, 4  ;;  %s2934_s30 = smov [#allocation14]   ;;  %s3535_s10 = int_to_ptr.vmem [resolvable:$true] %s2260_s10 }
  0xd5   : > { %v3349_v61 = vadd.s32 128, %v3263_v6  ;;  %vm457_vm15 = vcmp.lt.s32.totalorder %v3263_v6, 16  ;;  %s2832_s20 = sshll.u32 %s2934_s30, 4  ;;  %s2833_s20 = int_to_ptr.vmem [resolvable:$false] %s2832_s20 }
  0xd6   : > { %v422_v18 = vcombine.high %v399_v15, %v2923_v5  ;;  %432 = vrot.lane.b32.xlu1 %v414_v16, %s2924_s8  ;;  %v406_v20 = vrot.slane %v392_v17, %v398_v12  ;;  %v421_v22 = vrot.slane %v407_v19, %v398_v12  ;;  %v424_v24 = vcombine.high %v414_v16, %v2923_v5  ;;  %v695_v16 = vld [vmem:[#allocation5 + $0x18] sm:$0xf]  ;;  %p2835_p2 = scmp.lt.s32.totalorder %s3535_s10, %s2833_s20 }
  0xd8   : > { %426 = vrot.lane.b32.xlu0 %v422_v18, %s2925_s22  ;;  %v423_v21 = vcombine.high %v406_v20, %v2923_v5  ;;  %v425_v26 = vcombine.high %v421_v22, %v2923_v5  ;;  %v801_v18 = vld [vmem:[#allocation5 + $0x4] sm:$0xf] }
  0xda   : > { %430 = vrot.lane.b32.xlu1 %v423_v21, %s2926_s23  ;;  %s3533_s23 = scalar_lea.hbm %s3584_s7, %s2468_s18 }
  0xdc   : > { %428 = vrot.lane.b32.xlu0 %v406_v20, %s2927_s14  ;;  %s2246_s14 = scalar_lea.sflag [#allocation4], %s3233_s9 }
  0xde   : > { %436 = vrot.lane.b32.xlu1 %v421_v22, %s2928_s19  ;;  %s2828_s19 = scalar_lea.vmem %s3535_s10, 128 }
  0xdf   : > { %p2829_p12 = scmp.ne.s32.totalorder %s3535_s10, %s2828_s19 }
  0xe0   : > { %434 = vrot.lane.b32.xlu0 %v424_v24, %s2929_s21  ;;  %v885_v24 = vld [vmem:[#allocation5 + $0x10] sm:$0xf]  ;;  %s2834_s21 = scalar_lea.vmem %s2833_s20, 256 }
  0xe1   : > { %p2830_p1 = pnand %p2829_p12, %p3606_p13  ;;  %p2836_p0 = scmp.lt.s32.totalorder %s2834_s21, %s2828_s19 }
  0xe2   : > { %463 = vrot.lane.b32.xlu1 %v3283_v25, %s2930_s12 }
  0xe3   : > { %p2831_p3 = pneg %p2830_p1  ;;  %p2837_p4 = por %p2836_p0, %p2835_p2 }
  0xe4   : > { %438 = vrot.lane.b32.xlu0 %v425_v26, %s2931_s28 }
  0xe5   : > { %p2838_p10 = pnand %p2837_p4, %p2831_p3 }
  0xe6   : > { %473 = vrot.lane.b32.xlu1 %v3278_v23, %s2932_s17 }
  0xe8   : > { %466 = vrot.lane.b32.xlu0 %v3278_v23, %s2930_s12 }
  0xec   : > { %475 = vrot.lane.b32.xlu0 %v3283_v25, %s2932_s17 }
 0x148   : > { %v433_v28 = vpop.permute.xlu1 %432 }
 0x14a   : > { %v427_v29 = vpop.permute.xlu0 %426 }
 0x14b   : > { %v441_v31 = vsel %vm440_vm0, %v399_v15, %v427_v29 }
 0x14c   : > { %v431_v30 = vpop.permute.xlu1 %430 }
 0x14e   : > { %v429_v32 = vpop.permute.xlu0 %428 }
 0x14f   : > { %v443_v33 = vsel %vm442_vm1, %v441_v31, %v429_v32  ;;  %vm460_vm1 = vcmp.ge.s32.totalorder %v3349_v61, 240 }
 0x150   : > { %v445_v34 = vsel %vm444_vm2, %v443_v33, %v431_v30  ;;  %v437_v37 = vpop.permute.xlu1 %436  ;;  %v967_v30 = vld [vmem:[#allocation5 + $0x1c] sm:$0xf]  ;;  %v1075_v33 = vld [vmem:[#allocation5 + $0x8] sm:$0xf] }
 0x151   : > { %v447_v35 = vsel %vm446_vm3, %v445_v34, %v433_v28 }
 0x152   : > { %v435_v36 = vpop.permute.xlu0 %434 }
 0x153   : > { %v449_v38 = vsel %vm448_vm4, %v447_v35, %v435_v36  ;;  %v1159_v36 = vld [vmem:[#allocation5 + $0x14] sm:$0xf] }
 0x154   : > { %v451_v39 = vsel %vm450_vm5, %v449_v38, %v437_v37  ;;  %v464_v41 = vpop.permute.xlu1 %463  ;;  %v1241_v37 = vld [vmem:[#allocation5 + $0x20] sm:$0xf] }
 0x156   : > { %v439_v40 = vpop.permute.xlu0 %438 }
 0x157   : > { %v453_v43 = vsel %vm452_vm6, %v451_v39, %v439_v40 }
 0x158   : > { %vm455_vm7 = vcmp.eq.s32.totalorder %v453_v43, 0  ;;  %v474_v47 = vpop.permute.xlu1 %473  ;;  %vm456_vm13 = vcmp.eq.s32.totalorder %v453_v43, 15 }
 0x159   : > { %v483_v44 = vsel %vm455_vm7, 1, %v2923_v5  ;;  %v491_v56 = vsel %vm456_vm13, 1, %v2923_v5  ;;  %v531_v5 = vld [vmem:[#allocation5] sm:$0xf] }
 0x15a   : > { %v467_v45 = vpop.permute.xlu0 %466  ;;  %v3301_v46 = vrot.slane %v483_v44, %v486_v42  ;;  %v3325_v57 = vrot.slane %v491_v56, %v486_v42  ;;  %v1340_v56 = vld [vmem:[#allocation7] sm:$0xf] }
 0x15b   : > { %v469_v48 = vsel %vm468_vm8, %v467_v45, %v464_v41  ;;  %v472_v50 = vsel %vm468_vm8, %v464_v41, %v467_v45 }
 0x15c   : > { %vm488_vm11 = vcmp.eq.s32.totalorder %v3301_v46, 1  ;;  %vm496_vm14 = vcmp.eq.s32.totalorder %v3325_v57, 1 }
 0x15e   : > { %v476_v49 = vpop.permute.xlu0 %475 }
 0x15f   : > { %v478_v51 = vsel %vm477_vm9, %v474_v47, %v476_v49  ;;  %v482_v52 = vsel %vm477_vm9, %v476_v49, %v474_v47 }
 0x160   : > { %v490_v53 = vsel %vm488_vm11, %v482_v52, %v469_v48  ;;  %v489_v54 = vsel %vm488_vm11, %v478_v51, %v472_v50  ;;  %v3334_v58 = vsel %vm496_vm14, %v469_v48, %v482_v52  ;;  %v3340_v59 = vsel %vm496_vm14, %v472_v50, %v478_v51 }
 0x161   : > { %500 = vrot.lane.b32.xlu1 %v490_v53, %s2925_s22  ;;  %2408 = vmatprep.subr.msk.mxu0 %vm538_vm10, %v490_v53 }
 0x162   : > { %504 = vrot.lane.b32.xlu0 %v489_v54, %s2925_s22  ;;  %2409 = vmatpush1.msk.msra.mxu0 %vm538_vm10, %v489_v54 }
 0x163   : > { %2410 = vmatmul.mubr.msk.f32.vlgmr.msra.gmra.mrb[0].mxu0 %vm534_vm12, %v533_v55 }
 0x164   : > { %687 = vmatprep.mubr.f32.mxu0 %v2933_v27 }
 0x165   : > { %510 = vrot.lane.b32.xlu1 %v489_v54, %s2931_s28 }
 0x166   : > { %512 = vrot.lane.b32.xlu0 %v490_v53, %s2931_s28 }
 0x169   : > { %778 = vrot.lane.b32.xlu1 %v3283_v25, %s2925_s22 }
 0x16a   : > { %781 = vrot.lane.b32.xlu0 %v3278_v23, %s2925_s22 }
 0x16d   : > { %787 = vrot.lane.b32.xlu1 %v3278_v23, %s2931_s28 }
 0x16e   : > { %789 = vrot.lane.b32.xlu0 %v3283_v25, %s2931_s28 }
 0x171   : > { %1051 = vrot.lane.b32.xlu1 %v3334_v58, %s2925_s22 }
 0x172   : > { %1055 = vrot.lane.b32.xlu0 %v3340_v59, %s2925_s22 }
 0x175   : > { %1061 = vrot.lane.b32.xlu1 %v3340_v59, %s2931_s28 }
 0x176   : > { %1063 = vrot.lane.b32.xlu0 %v3334_v58, %s2931_s28 }
 0x1d3   : > { %v501_v60 = vpop.permute.xlu1 %500 }
 0x1d4   : > { %v505_v62 = vpop.permute.xlu0 %504 }
 0x1d5   : > { %v506_v63 = vsel %vm440_vm0, %v505_v62, %v501_v60  ;;  %v509_v2 = vsel %vm440_vm0, %v501_v60, %v505_v62  ;;  %v1344_v60 = vld [vmem:[#allocation8] sm:$0xf] }
 0x1d6   : > { %2411 = vmatprep.subr.msk.mxu0 %vm538_vm10, %v506_v63 }
 0x1d7   : > { %v511_v0 = vpop.permute.xlu1 %510 }
 0x1d8   : > { %v513_v1 = vpop.permute.xlu0 %512 }
 0x1d9   : > { %v514_v3 = vsel %vm452_vm6, %v511_v0, %v513_v1  ;;  %v518_v4 = vsel %vm452_vm6, %v513_v1, %v511_v0 }
 0x1da   : > { %v523_v7 = vsel %vm457_vm15, %v514_v3, %v509_v2  ;;  %v530_v8 = vsel %vm460_vm1, %v506_v63, %v518_v4 }
 0x1db   : > { %2412 = vmatpush1.msk.msra.mxu0 %vm538_vm10, %v523_v7  ;;  %v779_v9 = vpop.permute.xlu1 %778 }
 0x1dc   : > { %v782_v10 = vpop.permute.xlu0 %781  ;;  %2413 = vmatmul.mubr.msk.f32.vlgmr.msra.gmra.mrb[0].mxu0 %vm534_vm12, %v531_v5  ;;  %2414 = vmatprep.subr.msk.mxu0 %vm538_vm10, %v530_v8 }
 0x1dd   : > { %v783_v11 = vsel %vm440_vm0, %v782_v10, %v779_v9  ;;  %2415 = vmatpush1.msk.msra.mxu0 %vm538_vm10, %v514_v3  ;;  %769 = vmatprep.mubr.f32.mxu0 %v2933_v27  ;;  %v786_v12 = vsel %vm440_vm0, %v779_v9, %v782_v10 }
 0x1de   : > { %2417 = vmatprep.subr.msk.mxu0 %vm538_vm10, %v783_v11 }
 0x1df   : > { %v788_v13 = vpop.permute.xlu1 %787 }
 0x1e0   : > { %v790_v14 = vpop.permute.xlu0 %789 }
 0x1e1   : > { %v791_v15 = vsel %vm452_vm6, %v788_v13, %v790_v14  ;;  %v795_v19 = vsel %vm452_vm6, %v790_v14, %v788_v13 }
 0x1e2   : > { %v796_v17 = vsel %vm457_vm15, %v791_v15, %v786_v12  ;;  %v799_v20 = vsel %vm460_vm1, %v783_v11, %v795_v19  ;;  %v1413_v19 = vld [vmem:[#allocation10 + $0xc] sm:$0xf] }
 0x1e3   : > { %v1052_v21 = vpop.permute.xlu1 %1051 }
 0x1e4   : > { %2416 = vmatmul.mubr.msk.f32.vlgmr.msra.gmra.mrb[0].mxu0 %vm534_vm12, %v695_v16  ;;  %v1056_v22 = vpop.permute.xlu0 %1055 }
 0x1e5   : > { %2418 = vmatpush1.msk.msra.mxu0 %vm538_vm10, %v796_v17  ;;  %875 = vmatprep.mubr.f32.mxu0 %v2933_v27  ;;  %v1060_v31 = vsel %vm440_vm0, %v1052_v21, %v1056_v22 }
 0x1e6   : > { %2420 = vmatprep.subr.msk.mxu0 %vm538_vm10, %v3283_v25  ;;  %v1057_v25 = vsel %vm440_vm0, %v1056_v22, %v1052_v21 }
 0x1e7   : > { %v1062_v26 = vpop.permute.xlu1 %1061 }
 0x1e8   : > { %v1064_v28 = vpop.permute.xlu0 %1063 }
 0x1e9   : > { %v1065_v29 = vsel %vm452_vm6, %v1062_v26, %v1064_v28  ;;  %v1069_v34 = vsel %vm452_vm6, %v1064_v28, %v1062_v26 }
 0x1ea   : > { %v1070_v32 = vsel %vm457_vm15, %v1065_v29, %v1060_v31  ;;  %v1073_v35 = vsel %vm460_vm1, %v1057_v25, %v1069_v34 }
 0x1ec   : > { %2419 = vmatmul.mubr.msk.f32.vlgmr.msra.gmra.mrb[0].mxu0 %vm534_vm12, %v801_v18 }
 0x1ed   : > { %2421 = vmatpush1.msk.msra.mxu0 %vm538_vm10, %v3278_v23  ;;  %957 = vmatprep.mubr.f32.mxu0 %v2933_v27 }
 0x1ee   : > { %2423 = vmatprep.subr.msk.mxu0 %vm538_vm10, %v799_v20 }
 0x1f4   : > { %2422 = vmatmul.mubr.msk.f32.vlgmr.msra.gmra.mrb[0].mxu0 %vm534_vm12, %v885_v24 }
 0x1f5   : > { %2424 = vmatpush1.msk.msra.mxu0 %vm538_vm10, %v791_v15  ;;  %1041 = vmatprep.mubr.f32.mxu0 %v2933_v27 }
 0x1f6   : > { %2426 = vmatprep.subr.msk.mxu0 %vm538_vm10, %v1057_v25 }
 0x1fc   : > { %2425 = vmatmul.mubr.msk.f32.vlgmr.msra.gmra.mrb[0].mxu0 %vm534_vm12, %v967_v30  ;;  %v1411_v30 = vld [vmem:[#allocation10] sm:$0xf] }
 0x1fd   : > { %2427 = vmatpush1.msk.msra.mxu0 %vm538_vm10, %v1070_v32  ;;  %1149 = vmatprep.mubr.f32.mxu0 %v2933_v27 }
 0x1fe   : > { %2429 = vmatprep.subr.msk.mxu0 %vm538_vm10, %v3334_v58 }
 0x204   : > { %2428 = vmatmul.mubr.msk.f32.vlgmr.msra.gmra.mrb[0].mxu0 %vm534_vm12, %v1075_v33 }
 0x205   : > { %2430 = vmatpush1.msk.msra.mxu0 %vm538_vm10, %v3340_v59  ;;  %1231 = vmatprep.mubr.f32.mxu0 %v2933_v27 }
 0x206   : > { %2432 = vmatprep.subr.msk.mxu0 %vm538_vm10, %v1073_v35 }
 0x20c   : > { %2431 = vmatmul.mubr.msk.f32.vlgmr.msra.gmra.mrb[0].mxu0 %vm534_vm12, %v1159_v36 }
 0x20d   : > { %2433 = vmatpush1.msk.msra.mxu0 %vm538_vm10, %v1065_v29  ;;  %1315 = vmatprep.mubr.f32.mxu0 %v2933_v27 }
 0x214   : > { %2434 = vmatmul.mubr.msk.f32.vlgmr.msra.gmra.mrb[0].mxu0 %vm534_vm12, %v1241_v37 }
 0x2e7   : > { %v1317_v38 = vpop.f32.mrb[0].mxu0 }
 0x2e8   : > { %v1329_v39 = vmul.f32 %v1317_v38, %v1317_v38  ;;  %v1319_v40 = vpop.f32.mrb[1].mxu0  ;;  %v1324_v41 = vsel %vm538_vm10, %v1317_v38, 0.0 }
 0x2e9   : > { %v1325_v42 = vsel %vm538_vm10, %v1319_v40, 0.0  ;;  %v1330_v43 = vmul.f32 %v1319_v40, %v1319_v40 }
 0x2ea   : > { %v1326_v44 = vadd.f32 %v1325_v42, %v1324_v41  ;;  %v1331_v45 = vsel %vm538_vm10, %v1329_v39, 0.0  ;;  %v1679_v42 = vld [vmem:[#allocation10 + $0x4] sm:$0xf] }
 0x2eb   : > { %v1332_v47 = vsel %vm538_vm10, %v1330_v43, 0.0 }
 0x2ec   : > { %1327 = vadd.xlane.f32.xlu1 %v1326_v44  ;;  %v1333_v48 = vadd.f32 %v1332_v47, %v1331_v45  ;;  %v1763_v47 = vld [vmem:[#allocation10 + $0x10] sm:$0xf] }
 0x2ee   : > { %1334 = vadd.xlane.f32.xlu0 %v1333_v48 }
 0x379   : > { %v1328_v49 = vpop.xlane.xlu1 %1327 }
 0x37a   : > { %v1336_v50 = vmul.f32 0.00390625, %v1328_v49 }
 0x37b   : > { %v1335_v51 = vpop.xlane.xlu0 %1334 }
 0x37c   : > { %v1338_v52 = vmul.f32 %v1336_v50, %v1336_v50  ;;  %v1337_v53 = vmul.f32 0.00390625, %v1335_v51 }
 0x37e   : > { %v1339_v54 = vsub.f32 %v1337_v53, %v1338_v52  ;;  %v1845_v53 = vld [vmem:[#allocation10 + $0x1c] sm:$0xf] }
 0x380   : > { %v1341_v55 = vadd.f32 1e-05, %v1339_v54 }
 0x382   : > { %2626 = vrsqrt.f32 %v1341_v55 }
 0x38c   : > { %v2627_v58 = vpop.eup %2626 }
 0x38d   : > { %v1343_v59 = vmul.f32 %v2627_v58, %v1340_v56  ;;  %v1953_v56 = vld [vmem:[#allocation10 + $0x8] sm:$0xf] }
 0x38f   : > { %1349 = vperm.xlu0 %2623, %v1343_v59   ;;  %v1345_v62 = vmul.f32 %v1343_v59, %v1336_v50  ;;  %v2037_v59 = vld [vmem:[#allocation10 + $0x14] sm:$0xf] }
 0x391   : > { %v1346_v63 = vsub.f32 %v1344_v60, %v1345_v62  ;;  %v2119_v60 = vld [vmem:[#allocation10 + $0x20] sm:$0xf] }
 0x393   : > { %1356 = vperm.xlu1 %2624, %v1346_v63  }
 0x40e   : > { %v1350_v0 = vpop.permute.xlu0 %1349 }
 0x40f   : > { %v1353_v1 = vmul.f32 %v1350_v0, %v1319_v40  ;;  %v1352_v3 = vmul.f32 %v1350_v0, %v1317_v38  ;;  %v1573_v40 = vld [vmem:[#allocation10 + $0x18] sm:$0xf] }
 0x412   : > { %v1357_v2 = vpop.permute.xlu1 %1356 }
 0x413   : > { %v1360_v4 = vadd.f32 %v1357_v2, %v1353_v1  ;;  %v1359_v5 = vadd.f32 %v1357_v2, %v1352_v3 }
 0x415   : > { %v3416_v7 = vmax.f32 %v1360_v4, 0.0  ;;  %v3420_v8 = vmax.f32 %v1359_v5, 0.0 }
 0x417   : > { %1364 = vrot.lane.b32.xlu1 %v3416_v7, %s2930_s12 }
 0x41b   : > { %1368 = vrot.lane.b32.xlu1 %v3420_v8, %s2930_s12 }
 0x41f   : > { %1374 = vrot.lane.b32.xlu1 %v3420_v8, %s2932_s17 }
 0x423   : > { %1376 = vrot.lane.b32.xlu1 %v3416_v7, %s2932_s17 }
 0x489   : > { %v1365_v9 = vpop.permute.xlu1 %1364 }
 0x48d   : > { %v1369_v10 = vpop.permute.xlu1 %1368 }
 0x48e   : > { %v1370_v13 = vsel %vm468_vm8, %v1369_v10, %v1365_v9  ;;  %v1373_v14 = vsel %vm468_vm8, %v1365_v9, %v1369_v10 }
 0x491   : > { %v1375_v11 = vpop.permute.xlu1 %1374 }
 0x495   : > { %v1377_v12 = vpop.permute.xlu1 %1376 }
 0x496   : > { %v1378_v15 = vsel %vm477_vm9, %v1375_v11, %v1377_v12  ;;  %v1382_v16 = vsel %vm477_vm9, %v1377_v12, %v1375_v11 }
 0x497   : > { %v1384_v17 = vsel %vm488_vm11, %v1382_v16, %v1370_v13  ;;  %v1383_v18 = vsel %vm488_vm11, %v1378_v15, %v1373_v14  ;;  %v3450_v46 = vsel %vm496_vm14, %v1373_v14, %v1378_v15  ;;  %v1386_v20 = vsel %vm496_vm14, %v1370_v13, %v1382_v16  ;;  %v2218_v14 = vld [vmem:[#allocation11] sm:$0xf] }
 0x498   : > { %1400 = vrot.lane.b32.xlu0 %v1384_v17, %s2931_s28  ;;  %1388 = vrot.lane.b32.xlu1 %v1384_v17, %s2925_s22 }
 0x499   : > { %2435 = vmatprep.subr.msk.mxu1 %vm538_vm10, %v1384_v17  ;;  %v2222_v17 = vld [vmem:[#allocation13] sm:$0xf] }
 0x49a   : > { %2436 = vmatpush1.msk.msra.mxu1 %vm538_vm10, %v1383_v18 }
 0x49b   : > { %2437 = vmatmul.mubr.msk.f32.vlgmr.msra.gmra.mrb[0].mxu1 %vm534_vm12, %v1413_v19 }
 0x49c   : > { %1659 = vrot.lane.b32.xlu0 %v3420_v8, %s2925_s22  ;;  %1392 = vrot.lane.b32.xlu1 %v1383_v18, %s2925_s22 }
 0x49d   : > { %1565 = vmatprep.mubr.f32.mxu1 %v2933_v27 }
 0x4a0   : > { %1667 = vrot.lane.b32.xlu0 %v3416_v7, %s2931_s28  ;;  %1398 = vrot.lane.b32.xlu1 %v1383_v18, %s2931_s28 }
 0x4a4   : > { %1933 = vrot.lane.b32.xlu0 %v3450_v46, %s2925_s22  ;;  %1656 = vrot.lane.b32.xlu1 %v3416_v7, %s2925_s22 }
 0x4a8   : > { %1941 = vrot.lane.b32.xlu0 %v1386_v20, %s2931_s28  ;;  %1665 = vrot.lane.b32.xlu1 %v3420_v8, %s2931_s28 }
 0x4ac   : > { %1929 = vrot.lane.b32.xlu1 %v1386_v20, %s2925_s22 }
 0x4b0   : > { %1939 = vrot.lane.b32.xlu1 %v3450_v46, %s2931_s28 }
 0x50a   : > { %v1389_v21 = vpop.permute.xlu1 %1388  ;;  %v1401_v22 = vpop.permute.xlu0 %1400 }
 0x50e   : > { %v1393_v24 = vpop.permute.xlu1 %1392  ;;  %v1660_v31 = vpop.permute.xlu0 %1659 }
 0x50f   : > { %v1394_v25 = vsel %vm440_vm0, %v1393_v24, %v1389_v21  ;;  %v1397_v57 = vsel %vm440_vm0, %v1389_v21, %v1393_v24 }
 0x510   : > { %2438 = vmatprep.subr.msk.mxu1 %vm538_vm10, %v1394_v25 }
 0x512   : > { %v1399_v26 = vpop.permute.xlu1 %1398  ;;  %v1668_v36 = vpop.permute.xlu0 %1667 }
 0x513   : > { %v1402_v28 = vsel %vm452_vm6, %v1399_v26, %v1401_v22  ;;  %v1406_v29 = vsel %vm452_vm6, %v1401_v22, %v1399_v26 }
 0x514   : > { %v1407_v32 = vsel %vm457_vm15, %v1402_v28, %v1397_v57  ;;  %v1410_v33 = vsel %vm460_vm1, %v1394_v25, %v1406_v29 }
 0x515   : > { %2439 = vmatpush1.msk.msra.mxu1 %vm538_vm10, %v1407_v32 }
 0x516   : > { %v1657_v34 = vpop.permute.xlu1 %1656  ;;  %2440 = vmatmul.mubr.msk.f32.vlgmr.msra.gmra.mrb[0].mxu1 %vm534_vm12, %v1411_v30  ;;  %2441 = vmatprep.subr.msk.mxu1 %vm538_vm10, %v1410_v33  ;;  %v1934_v48 = vpop.permute.xlu0 %1933 }
 0x517   : > { %v1661_v35 = vsel %vm440_vm0, %v1660_v31, %v1657_v34  ;;  %2442 = vmatpush1.msk.msra.mxu1 %vm538_vm10, %v1402_v28  ;;  %1647 = vmatprep.mubr.f32.mxu1 %v2933_v27  ;;  %v1664_v38 = vsel %vm440_vm0, %v1657_v34, %v1660_v31 }
 0x518   : > { %2444 = vmatprep.subr.msk.mxu1 %vm538_vm10, %v1661_v35 }
 0x51a   : > { %v1666_v37 = vpop.permute.xlu1 %1665  ;;  %v1942_v51 = vpop.permute.xlu0 %1941 }
 0x51b   : > { %v1669_v39 = vsel %vm452_vm6, %v1666_v37, %v1668_v36  ;;  %v1673_v43 = vsel %vm452_vm6, %v1668_v36, %v1666_v37 }
 0x51c   : > { %v1674_v41 = vsel %vm457_vm15, %v1669_v39, %v1664_v38  ;;  %v1677_v44 = vsel %vm460_vm1, %v1661_v35, %v1673_v43 }
 0x51e   : > { %2443 = vmatmul.mubr.msk.f32.vlgmr.msra.gmra.mrb[0].mxu1 %vm534_vm12, %v1573_v40  ;;  %v1930_v45 = vpop.permute.xlu1 %1929 }
 0x51f   : > { %2445 = vmatpush1.msk.msra.mxu1 %vm538_vm10, %v1674_v41  ;;  %1753 = vmatprep.mubr.f32.mxu1 %v2933_v27  ;;  %v1935_v49 = vsel %vm440_vm0, %v1934_v48, %v1930_v45  ;;  %v1938_v54 = vsel %vm440_vm0, %v1930_v45, %v1934_v48 }
 0x520   : > { %2447 = vmatprep.subr.msk.mxu1 %vm538_vm10, %v3416_v7 }
 0x522   : > { %v1940_v50 = vpop.permute.xlu1 %1939 }
 0x523   : > { %v1943_v52 = vsel %vm452_vm6, %v1940_v50, %v1942_v51  ;;  %v1947_v58 = vsel %vm452_vm6, %v1942_v51, %v1940_v50 }
 0x524   : > { %v1948_v55 = vsel %vm457_vm15, %v1943_v52, %v1938_v54  ;;  %v1951_v6 = vsel %vm460_vm1, %v1935_v49, %v1947_v58 }
 0x526   : > { %2446 = vmatmul.mubr.msk.f32.vlgmr.msra.gmra.mrb[0].mxu1 %vm534_vm12, %v1679_v42 }
 0x527   : > { %2448 = vmatpush1.msk.msra.mxu1 %vm538_vm10, %v3420_v8  ;;  %1835 = vmatprep.mubr.f32.mxu1 %v2933_v27 }
 0x528   : > { %2450 = vmatprep.subr.msk.mxu1 %vm538_vm10, %v1677_v44 }
 0x52e   : > { %2449 = vmatmul.mubr.msk.f32.vlgmr.msra.gmra.mrb[0].mxu1 %vm534_vm12, %v1763_v47 }
 0x52f   : > { %2451 = vmatpush1.msk.msra.mxu1 %vm538_vm10, %v1669_v39  ;;  %1919 = vmatprep.mubr.f32.mxu1 %v2933_v27 }
 0x530   : > { %2453 = vmatprep.subr.msk.mxu1 %vm538_vm10, %v1935_v49 }
 0x536   : > { %2452 = vmatmul.mubr.msk.f32.vlgmr.msra.gmra.mrb[0].mxu1 %vm534_vm12, %v1845_v53 }
 0x537   : > { %2454 = vmatpush1.msk.msra.mxu1 %vm538_vm10, %v1948_v55  ;;  %2027 = vmatprep.mubr.f32.mxu1 %v2933_v27 }
 0x538   : > { %2456 = vmatprep.subr.msk.mxu1 %vm538_vm10, %v1386_v20 }
 0x53e   : > { %2455 = vmatmul.mubr.msk.f32.vlgmr.msra.gmra.mrb[0].mxu1 %vm534_vm12, %v1953_v56 }
 0x53f   : > { %2457 = vmatpush1.msk.msra.mxu1 %vm538_vm10, %v3450_v46  ;;  %2109 = vmatprep.mubr.f32.mxu1 %v2933_v27 }
 0x540   : > { %2459 = vmatprep.subr.msk.mxu1 %vm538_vm10, %v1951_v6 }
 0x546   : > { %2458 = vmatmul.mubr.msk.f32.vlgmr.msra.gmra.mrb[0].mxu1 %vm534_vm12, %v2037_v59 }
 0x547   : > { %2460 = vmatpush1.msk.msra.mxu1 %vm538_vm10, %v1943_v52  ;;  %2193 = vmatprep.mubr.f32.mxu1 %v2933_v27 }
 0x54e   : > { %2461 = vmatmul.mubr.msk.f32.vlgmr.msra.gmra.mrb[0].mxu1 %vm534_vm12, %v2119_v60 }
 0x621   : > { %v2195_v62 = vpop.f32.mrb[0].mxu1 }
 0x622   : > { %v2207_v63 = vmul.f32 %v2195_v62, %v2195_v62  ;;  %v2197_v0 = vpop.f32.mrb[1].mxu1  ;;  %v2202_v61 = vsel %vm538_vm10, %v2195_v62, 0.0 }
 0x623   : > { %v2203_v1 = vsel %vm538_vm10, %v2197_v0, 0.0  ;;  %v2208_v2 = vmul.f32 %v2197_v0, %v2197_v0 }
 0x624   : > { %v2204_v3 = vadd.f32 %v2203_v1, %v2202_v61  ;;  %v2209_v4 = vsel %vm538_vm10, %v2207_v63, 0.0 }
 0x625   : > { %v2210_v5 = vsel %vm538_vm10, %v2208_v2, 0.0 }
 0x626   : > { %2205 = vadd.xlane.f32.xlu1 %v2204_v3  ;;  %v2211_v7 = vadd.f32 %v2210_v5, %v2209_v4 }
 0x628   : > { %2212 = vadd.xlane.f32.xlu0 %v2211_v7 }
 0x6b3   : > { %v2206_v27 = vpop.xlane.xlu1 %2205 }
 0x6b4   : > { %v2214_v8 = vmul.f32 0.00390625, %v2206_v27 }
 0x6b5   : > { %v2213_v9 = vpop.xlane.xlu0 %2212 }
 0x6b6   : > { %v2216_v10 = vmul.f32 %v2214_v8, %v2214_v8  ;;  %v2215_v11 = vmul.f32 0.00390625, %v2213_v9 }
 0x6b8   : > { %v2217_v12 = vsub.f32 %v2215_v11, %v2216_v10 }
 0x6ba   : > { %v2219_v13 = vadd.f32 1e-05, %v2217_v12 }
 0x6bc   : > { %2628 = vrsqrt.f32 %v2219_v13 }
 0x6c6   : > { %v2629_v15 = vpop.eup %2628 }
 0x6c7   : > { %v2221_v16 = vmul.f32 %v2629_v15, %v2218_v14 }
 0x6c9   : > { %2227 = vperm.xlu0 %2623, %v2221_v16   ;;  %v2223_v18 = vmul.f32 %v2221_v16, %v2214_v8 }
 0x6cb   : > { %v2224_v19 = vsub.f32 %v2222_v17, %v2223_v18 }
 0x6cd   : > { %2234 = vperm.xlu1 %2624, %v2224_v19  }
 0x748   : > { %v2228_v46 = vpop.permute.xlu0 %2227 }
 0x749   : > { %v2230_v20 = vmul.f32 %v2228_v46, %v2195_v62  ;;  %v2231_v21 = vmul.f32 %v2228_v46, %v2197_v0 }
 0x74c   : > { %v2235_v22 = vpop.permute.xlu1 %2234 }
 0x74d   : > { %v2237_v24 = vadd.f32 %v2235_v22, %v2230_v20  ;;  %v2238_v25 = vadd.f32 %v2235_v22, %v2231_v21 }
 0x74f   : > { %v2241_v26 = vcombine.low %v2237_v24, %v2238_v25 }
 0x751   : > { %v2243_v57 = vadd.f32 %v2241_v26, %v3278_v23 }
 0x753   : > { %2244 = vst [vmem:[%s373_s29] sm:$0xff] %v2243_v57 }
 0x754   : > { %2841 = shalt.err (!%p2838_p10)
}
 0x755   : > { %s2842_s9 = scalar_lea.hbm %s3533_s23, 128  ;;  %s2846_s17 = scalar_lea.hbm %s3584_s7, 256 }
 0x756   : > { %p2843_p11 = scmp.ne.s32.totalorder %s3533_s23, %s2842_s9  ;;  %p2847_p7 = scmp.lt.u32.totalorder %s3533_s23, %s3584_s7 }
 0x757   : > { %p2848_p6 = scmp.lt.u32.totalorder %s2846_s17, %s2842_s9  ;;  %p2850_p12 = scmp.lt.u32.totalorder %s2842_s9, %s3533_s23 }
 0x758   : > { %p2844_p8 = pnand %p2843_p11, %p3606_p13 }
 0x759   : > { %p2849_p9 = por %p2848_p6, %p2847_p7 }
 0x75a   : > { %p2845_p5 = pneg %p2844_p8 }
 0x75b   : > { %p2851_p1 = por %p2850_p12, %p2849_p9 }
 0x75d   : > { %p2852_p3 = pnand %p2851_p1, %p2845_p5 }
 0x75f   : > { %2855 = shalt.err (!%p2852_p3)
}
 0x760   : > { %2527 = dma.vmem_to_hbm [thread:$0]  (%p3606_p13), %s3535_s10, 128, %s3533_s23, %s2246_s14  }
 0x761 PF: > { %s2272_s8 = sand.u32 1, %s2898_s24   ;;  %p3607_p2 = scmp.ne.s32.totalorder %s3595_s16, 0 }
 0x762   : > { %p3608_p0 = scmp.ge.s32.totalorder %s2910_s27, 2  ;;  %s2273_s22 = scalar_lea.sflag [#allocation4], %s2272_s8 }
 0x764   : > { %p2553_p4 = pnand %p3608_p0, %p3607_p2 }
 0x766   : > { %2893 = dma.done.wait (!%p2553_p4), %s2273_s22, 128  }
 0x767   : > { %2895 = vsyncadd (!%p2553_p4), %s2273_s22, 4294967168  ;;  %p23_p10 = scmp.ge.s32.totalorder %s3157_s11, 4   ;;  %s3609_s24 = smov %s2902_s25 }
 0x768   : > { %s3610_s25 = smov %s2906_s26  ;;  %s3611_s26 = smov %s3168_s13 }
 0x769   : > { %s3612_s27 = smov %s3157_s11  ;;  %25 = sbr.rel (!%p23_p10) target bundleno = 8 (0x8), region = 133 }
 0x770   :  { %2278 = vsyncpa [#allocation3], 1 }
 0x771   :  { %2280 = vsyncpa [#allocation3 + $0x1], 1 }
 0x772   :  { %2281 = vsyncpa [#allocation6], 1 }
 0x773   :  { %2282 = vsyncpa [#allocation9], 1 }
 0x774   :  { %2283 = vsyncpa [#allocation12], 1 }
 0x775   :  { %2284 = vsyncpa [#allocation4], 1 }
 0x776   :  { %2286 = vsyncpa [#allocation4 + $0x1], 1 }

</bundles_post_ra>
